<compile_context>
chip_gen: v7x
topology: tpu7x:2x2x1
jax: 0.10.0
libtpu: 0.0.40
codegen_flags: <defaults>
</compile_context>

<pallas_src>
import functools

import jax
import jax.numpy as jnp
from jax.experimental import pallas as pl
from jax.experimental.pallas import tpu as pltpu


# ---------------------------------------------------------------------------
# Fully fused Pallas kernel:
#   zero-pad -> conv3x3 (+bias, ReLU) -> maxpool2x2 -> flatten -> linear
# ---------------------------------------------------------------------------
def _fused_net_kernel(x_ref, wbd_ref, cbias_ref, fcw_ref, fcb_ref, out_ref,
                      xpad_ref, *, batch, c_in, c_out, h, w):
    """
    x_ref    : (B*C_in, H*W)          input images, row = b*C_in + ci
    wbd_ref  : (9*C_out*B, B*C_in)    conv weight, tap-major, block-diag over batch
                                      row = tap*(C_out*B) + c*B + b, col = b*C_in + ci
    cbias_ref: (C_out*B, 1)           conv bias, row = c*B + b
    fcw_ref  : (C_out, L_pool, NC)    FC weight on padded-stride columns, nonzero only
                                      at pool-anchor columns q = (2*ii)*(W+2) + 2*jj
    fcb_ref  : (B, NC)                FC bias tiled per batch row
    out_ref  : (B, NC)                logits
    xpad_ref : (B*C_in, (H+2)*(W+2))  VMEM scratch holding the zero-padded images
    """
    wp = w + 2                                   # padded row stride
    nbc = c_out * batch                          # conv-output rows (c*B + b)
    l_pool = (h - 2) * wp + (w - 2) + 1          # last pool anchor column + 1
    l_m1 = l_pool + wp
    l_conv = l_m1 + 1

    # ---- in-kernel zero padding (halo for padding=1 'same' conv) ----------
    xpad_ref[...] = jnp.zeros(xpad_ref.shape, xpad_ref.dtype)
    for i in range(h):
        dst = (i + 1) * wp + 1
        xpad_ref[:, dst:dst + w] = x_ref[:, i * w:(i + 1) * w]
    xp = xpad_ref[...]                           # (B*C_in, (H+2)*(W+2))

    # ---- 3x3 conv: 9 statically-shifted slices x block-diag tap weights ----
    acc = jnp.zeros((nbc, l_conv), jnp.float32)
    for kh in range(3):
        for kw in range(3):
            t = kh * 3 + kw
            d = kh * wp + kw
            piece = xp[:, d:d + l_conv]                          # (B*C_in, l_conv)
            acc = acc + jnp.dot(wbd_ref[t * nbc:(t + 1) * nbc, :], piece,
                                preferred_element_type=jnp.float32)
    conv = jnp.maximum(acc + cbias_ref[...], 0.0)                # (C_out*B, l_conv)

    # ---- 2x2 max pool (valid results live at columns (2*ii)*wp + 2*jj) -----
    m1 = jnp.maximum(conv[:, :l_m1], conv[:, 1:l_m1 + 1])        # max over kw
    m2 = jnp.maximum(m1[:, :l_pool], m1[:, wp:wp + l_pool])      # max over kh

    # ---- flatten + classifier: batch rides the MXU M dimension -------------
    logits = fcb_ref[...]                                        # (B, NC)
    for c in range(c_out):
        logits = logits + jnp.dot(m2[c * batch:(c + 1) * batch, :], fcw_ref[c],
                                  preferred_element_type=jnp.float32)
    out_ref[...] = logits.astype(out_ref.dtype)


# ---------------------------------------------------------------------------
# Wrapper: the only out-of-kernel work is a free contiguous reshape of x
# ---------------------------------------------------------------------------
def net_forward_impl(x, packed):
    b, c_in, h, w = x.shape
    num_classes = packed["fc_b"].shape[1]
    c_out = packed["conv_b"].shape[0] // b
    x2d = x.reshape(b * c_in, h * w)

    kernel = functools.partial(_fused_net_kernel, batch=b, c_in=c_in,
                               c_out=c_out, h=h, w=w)
    vmem = pl.BlockSpec(memory_space=pltpu.MemorySpace.VMEM)
    return pl.pallas_call(
        kernel,
        out_shape=jax.ShapeDtypeStruct((b, num_classes), jnp.float32),
        in_specs=[vmem, vmem, vmem, vmem, vmem],
        out_specs=vmem,
        scratch_shapes=[pltpu.VMEM((b * c_in, (h + 2) * (w + 2)), jnp.float32)],
    )(x2d, packed["conv_w"], packed["conv_b"], packed["fc_w"], packed["fc_b"])


net_forward = jax.jit(net_forward_impl)


# ---------------------------------------------------------------------------
# One-time parameter packing (all permutations moved out of the hot path)
# ---------------------------------------------------------------------------
def pack_params(params, *, batch, height, width, num_classes):
    conv_w, conv_b = params["conv_w"], params["conv_b"]
    fc_w, fc_b = params["fc_w"], params["fc_b"]
    c_out, c_in, k, _ = conv_w.shape
    hp, wq = height // 2, width // 2
    wpad = width + 2
    l_pool = (height - 2) * wpad + (width - 2) + 1

    # Conv weight: tap-major, block-diagonal over batch.
    wt = conv_w.transpose(2, 3, 0, 1).reshape(k * k, c_out, c_in)
    wbd = jnp.zeros((k * k, c_out, batch, batch, c_in), conv_w.dtype)
    for b in range(batch):
        wbd = wbd.at[:, :, b, b, :].set(wt)
    wbd = wbd.reshape(k * k * c_out * batch, batch * c_in)

    cbias = jnp.repeat(conv_b, batch).reshape(c_out * batch, 1)

    # FC weight expanded onto padded-stride conv columns: value at pool-anchor
    # columns q = (2*ii)*wpad + 2*jj (PyTorch flatten order (c, ii, jj)), 0 elsewhere.
    fcw3 = fc_w.reshape(c_out, hp, wq, num_classes)
    fcw_e = jnp.zeros((c_out, height, wpad, num_classes), fc_w.dtype)
    fcw_e = fcw_e.at[:, ::2, 0:width:2, :].set(fcw3)
    fcw_e = fcw_e.reshape(c_out, height * wpad, num_classes)[:, :l_pool, :]

    fcb = jnp.tile(fc_b.reshape(1, num_classes), (batch, 1))
    return {"conv_w": wbd, "conv_b": cbias, "fc_w": fcw_e, "fc_b": fcb}


# ---------------------------------------------------------------------------
# Deterministic parameter init (kaiming-normal conv / xavier-uniform linear)
# ---------------------------------------------------------------------------
def init_params(key, c_in=4, c_out=8, hw=16, num_classes=10):
    k_conv, k_fc = jax.random.split(key)
    k = 3
    fan_out_conv = c_out * k * k
    conv_w = jax.random.normal(k_conv, (c_out, c_in, k, k), jnp.float32) * jnp.sqrt(
        2.0 / fan_out_conv
    )
    conv_b = jnp.zeros((c_out,), jnp.float32)

    feat_dim = c_out * (hw // 2) * (hw // 2)
    bound = jnp.sqrt(6.0 / (feat_dim + num_classes))
    fc_w = jax.random.uniform(
        k_fc, (feat_dim, num_classes), jnp.float32, minval=-bound, maxval=bound
    )
    fc_b = jnp.zeros((num_classes,), jnp.float32)
    return {"conv_w": conv_w, "conv_b": conv_b, "fc_w": fc_w, "fc_b": fc_b}


# ---------------------------------------------------------------------------
# Pure-JAX reference (for correctness check)
# ---------------------------------------------------------------------------
def net_forward_ref(x, params):
    y = jax.lax.conv_general_dilated(
        x, params["conv_w"], window_strides=(1, 1), padding="SAME",
        dimension_numbers=("NCHW", "OIHW", "NCHW"),
    ) + params["conv_b"][None, :, None, None]
    y = jnp.maximum(y, 0.0)
    y = jax.lax.reduce_window(
        y, -jnp.inf, jax.lax.max, (1, 1, 2, 2), (1, 1, 2, 2), "VALID"
    )
    flat = y.reshape(y.shape[0], -1)
    return flat @ params["fc_w"] + params["fc_b"]


if __name__ == "__main__":
    key = jax.random.PRNGKey(0)
    k_x, k_p = jax.random.split(key)

    B, C, H, W = 2, 4, 16, 16
    num_classes = 10
    x = jax.random.normal(k_x, (B, C, H, W), jnp.float32)
    params = init_params(k_p, c_in=C, c_out=8, hw=H, num_classes=num_classes)
    packed = pack_params(params, batch=B, height=H, width=W,
                         num_classes=num_classes)

    logits = jax.block_until_ready(net_forward(x, packed))
    ref = jax.block_until_ready(net_forward_ref(x, params))

    assert logits.shape == (B, num_classes)
    assert jnp.allclose(logits, ref, atol=2e-4, rtol=2e-4)
    print("KERNEL_OK")
</pallas_src>

<mosaic_0001>
module attributes {stable_mosaic.version = 11 : i64} {
  func.func @_fused_net_kernel(%arg0: memref<8x256xf32, #tpu.memory_space<vmem>>, %arg1: memref<144x8xf32, #tpu.memory_space<vmem>>, %arg2: memref<16x1xf32, #tpu.memory_space<vmem>>, %arg3: memref<8x267x10xf32, #tpu.memory_space<vmem>>, %arg4: memref<2x10xf32, #tpu.memory_space<vmem>>, %arg5: memref<2x10xf32, #tpu.memory_space<vmem>>, %arg6: memref<8x324xf32, #tpu.memory_space<vmem>>) attributes {dimension_semantics = [], scalar_prefetch = 0 : i64, scratch_operands = 1 : i64, tpu.core_type = #tpu.core_type<tc>} {
    %cst = arith.constant 0.000000e+00 : f32
    %0 = vector.broadcast %cst : f32 to vector<8x324xf32>
    %c0 = arith.constant 0 : index
    %c0_0 = arith.constant 0 : index
    %1 = vector.load %arg6[%c0, %c0_0] : memref<8x324xf32, #tpu.memory_space<vmem>>, vector<8x324xf32>
    tpu.vector_store %arg6[%c0, %c0_0], %0 {strides = array<i32>} : memref<8x324xf32, #tpu.memory_space<vmem>>, vector<8x324xf32>,
    %c0_1 = arith.constant 0 : index
    %c0_2 = arith.constant 0 : index
    %2 = vector.load %arg0[%c0_1, %c0_2] : memref<8x256xf32, #tpu.memory_space<vmem>>, vector<8x16xf32>
    %c0_3 = arith.constant 0 : index
    %c19 = arith.constant 19 : index
    %3 = vector.load %arg6[%c0_3, %c19] : memref<8x324xf32, #tpu.memory_space<vmem>>, vector<8x16xf32>
    tpu.vector_store %arg6[%c0_3, %c19], %2 {strides = array<i32>} : memref<8x324xf32, #tpu.memory_space<vmem>>, vector<8x16xf32>,
    %c0_4 = arith.constant 0 : index
    %c16 = arith.constant 16 : index
    %4 = vector.load %arg0[%c0_4, %c16] : memref<8x256xf32, #tpu.memory_space<vmem>>, vector<8x16xf32>
    %c0_5 = arith.constant 0 : index
    %c37 = arith.constant 37 : index
    %5 = vector.load %arg6[%c0_5, %c37] : memref<8x324xf32, #tpu.memory_space<vmem>>, vector<8x16xf32>
    tpu.vector_store %arg6[%c0_5, %c37], %4 {strides = array<i32>} : memref<8x324xf32, #tpu.memory_space<vmem>>, vector<8x16xf32>,
    %c0_6 = arith.constant 0 : index
    %c32 = arith.constant 32 : index
    %6 = vector.load %arg0[%c0_6, %c32] : memref<8x256xf32, #tpu.memory_space<vmem>>, vector<8x16xf32>
    %c0_7 = arith.constant 0 : index
    %c55 = arith.constant 55 : index
    %7 = vector.load %arg6[%c0_7, %c55] : memref<8x324xf32, #tpu.memory_space<vmem>>, vector<8x16xf32>
    tpu.vector_store %arg6[%c0_7, %c55], %6 {strides = array<i32>} : memref<8x324xf32, #tpu.memory_space<vmem>>, vector<8x16xf32>,
    %c0_8 = arith.constant 0 : index
    %c48 = arith.constant 48 : index
    %8 = vector.load %arg0[%c0_8, %c48] : memref<8x256xf32, #tpu.memory_space<vmem>>, vector<8x16xf32>
    %c0_9 = arith.constant 0 : index
    %c73 = arith.constant 73 : index
    %9 = vector.load %arg6[%c0_9, %c73] : memref<8x324xf32, #tpu.memory_space<vmem>>, vector<8x16xf32>
    tpu.vector_store %arg6[%c0_9, %c73], %8 {strides = array<i32>} : memref<8x324xf32, #tpu.memory_space<vmem>>, vector<8x16xf32>,
    %c0_10 = arith.constant 0 : index
    %c64 = arith.constant 64 : index
    %10 = vector.load %arg0[%c0_10, %c64] : memref<8x256xf32, #tpu.memory_space<vmem>>, vector<8x16xf32>
    %c0_11 = arith.constant 0 : index
    %c91 = arith.constant 91 : index
    %11 = vector.load %arg6[%c0_11, %c91] : memref<8x324xf32, #tpu.memory_space<vmem>>, vector<8x16xf32>
    tpu.vector_store %arg6[%c0_11, %c91], %10 {strides = array<i32>} : memref<8x324xf32, #tpu.memory_space<vmem>>, vector<8x16xf32>,
    %c0_12 = arith.constant 0 : index
    %c80 = arith.constant 80 : index
    %12 = vector.load %arg0[%c0_12, %c80] : memref<8x256xf32, #tpu.memory_space<vmem>>, vector<8x16xf32>
    %c0_13 = arith.constant 0 : index
    %c109 = arith.constant 109 : index
    %13 = vector.load %arg6[%c0_13, %c109] : memref<8x324xf32, #tpu.memory_space<vmem>>, vector<8x16xf32>
    tpu.vector_store %arg6[%c0_13, %c109], %12 {strides = array<i32>} : memref<8x324xf32, #tpu.memory_space<vmem>>, vector<8x16xf32>,
    %c0_14 = arith.constant 0 : index
    %c96 = arith.constant 96 : index
    %14 = vector.load %arg0[%c0_14, %c96] : memref<8x256xf32, #tpu.memory_space<vmem>>, vector<8x16xf32>
    %c0_15 = arith.constant 0 : index
    %c127 = arith.constant 127 : index
    %15 = vector.load %arg6[%c0_15, %c127] : memref<8x324xf32, #tpu.memory_space<vmem>>, vector<8x16xf32>
    tpu.vector_store %arg6[%c0_15, %c127], %14 {strides = array<i32>} : memref<8x324xf32, #tpu.memory_space<vmem>>, vector<8x16xf32>,
    %c0_16 = arith.constant 0 : index
    %c112 = arith.constant 112 : index
    %16 = vector.load %arg0[%c0_16, %c112] : memref<8x256xf32, #tpu.memory_space<vmem>>, vector<8x16xf32>
    %c0_17 = arith.constant 0 : index
    %c145 = arith.constant 145 : index
    %17 = vector.load %arg6[%c0_17, %c145] : memref<8x324xf32, #tpu.memory_space<vmem>>, vector<8x16xf32>
    tpu.vector_store %arg6[%c0_17, %c145], %16 {strides = array<i32>} : memref<8x324xf32, #tpu.memory_space<vmem>>, vector<8x16xf32>,
    %c0_18 = arith.constant 0 : index
    %c128 = arith.constant 128 : index
    %18 = vector.load %arg0[%c0_18, %c128] : memref<8x256xf32, #tpu.memory_space<vmem>>, vector<8x16xf32>
    %c0_19 = arith.constant 0 : index
    %c163 = arith.constant 163 : index
    %19 = vector.load %arg6[%c0_19, %c163] : memref<8x324xf32, #tpu.memory_space<vmem>>, vector<8x16xf32>
    tpu.vector_store %arg6[%c0_19, %c163], %18 {strides = array<i32>} : memref<8x324xf32, #tpu.memory_space<vmem>>, vector<8x16xf32>,
    %c0_20 = arith.constant 0 : index
    %c144 = arith.constant 144 : index
    %20 = vector.load %arg0[%c0_20, %c144] : memref<8x256xf32, #tpu.memory_space<vmem>>, vector<8x16xf32>
    %c0_21 = arith.constant 0 : index
    %c181 = arith.constant 181 : index
    %21 = vector.load %arg6[%c0_21, %c181] : memref<8x324xf32, #tpu.memory_space<vmem>>, vector<8x16xf32>
    tpu.vector_store %arg6[%c0_21, %c181], %20 {strides = array<i32>} : memref<8x324xf32, #tpu.memory_space<vmem>>, vector<8x16xf32>,
    %c0_22 = arith.constant 0 : index
    %c160 = arith.constant 160 : index
    %22 = vector.load %arg0[%c0_22, %c160] : memref<8x256xf32, #tpu.memory_space<vmem>>, vector<8x16xf32>
    %c0_23 = arith.constant 0 : index
    %c199 = arith.constant 199 : index
    %23 = vector.load %arg6[%c0_23, %c199] : memref<8x324xf32, #tpu.memory_space<vmem>>, vector<8x16xf32>
    tpu.vector_store %arg6[%c0_23, %c199], %22 {strides = array<i32>} : memref<8x324xf32, #tpu.memory_space<vmem>>, vector<8x16xf32>,
    %c0_24 = arith.constant 0 : index
    %c176 = arith.constant 176 : index
    %24 = vector.load %arg0[%c0_24, %c176] : memref<8x256xf32, #tpu.memory_space<vmem>>, vector<8x16xf32>
    %c0_25 = arith.constant 0 : index
    %c217 = arith.constant 217 : index
    %25 = vector.load %arg6[%c0_25, %c217] : memref<8x324xf32, #tpu.memory_space<vmem>>, vector<8x16xf32>
    tpu.vector_store %arg6[%c0_25, %c217], %24 {strides = array<i32>} : memref<8x324xf32, #tpu.memory_space<vmem>>, vector<8x16xf32>,
    %c0_26 = arith.constant 0 : index
    %c192 = arith.constant 192 : index
    %26 = vector.load %arg0[%c0_26, %c192] : memref<8x256xf32, #tpu.memory_space<vmem>>, vector<8x16xf32>
    %c0_27 = arith.constant 0 : index
    %c235 = arith.constant 235 : index
    %27 = vector.load %arg6[%c0_27, %c235] : memref<8x324xf32, #tpu.memory_space<vmem>>, vector<8x16xf32>
    tpu.vector_store %arg6[%c0_27, %c235], %26 {strides = array<i32>} : memref<8x324xf32, #tpu.memory_space<vmem>>, vector<8x16xf32>,
    %c0_28 = arith.constant 0 : index
    %c208 = arith.constant 208 : index
    %28 = vector.load %arg0[%c0_28, %c208] : memref<8x256xf32, #tpu.memory_space<vmem>>, vector<8x16xf32>
    %c0_29 = arith.constant 0 : index
    %c253 = arith.constant 253 : index
    %29 = vector.load %arg6[%c0_29, %c253] : memref<8x324xf32, #tpu.memory_space<vmem>>, vector<8x16xf32>
    tpu.vector_store %arg6[%c0_29, %c253], %28 {strides = array<i32>} : memref<8x324xf32, #tpu.memory_space<vmem>>, vector<8x16xf32>,
    %c0_30 = arith.constant 0 : index
    %c224 = arith.constant 224 : index
    %30 = vector.load %arg0[%c0_30, %c224] : memref<8x256xf32, #tpu.memory_space<vmem>>, vector<8x16xf32>
    %c0_31 = arith.constant 0 : index
    %c271 = arith.constant 271 : index
    %31 = vector.load %arg6[%c0_31, %c271] : memref<8x324xf32, #tpu.memory_space<vmem>>, vector<8x16xf32>
    tpu.vector_store %arg6[%c0_31, %c271], %30 {strides = array<i32>} : memref<8x324xf32, #tpu.memory_space<vmem>>, vector<8x16xf32>,
    %c0_32 = arith.constant 0 : index
    %c240 = arith.constant 240 : index
    %32 = vector.load %arg0[%c0_32, %c240] : memref<8x256xf32, #tpu.memory_space<vmem>>, vector<8x16xf32>
    %c0_33 = arith.constant 0 : index
    %c289 = arith.constant 289 : index
    %33 = vector.load %arg6[%c0_33, %c289] : memref<8x324xf32, #tpu.memory_space<vmem>>, vector<8x16xf32>
    tpu.vector_store %arg6[%c0_33, %c289], %32 {strides = array<i32>} : memref<8x324xf32, #tpu.memory_space<vmem>>, vector<8x16xf32>,
    %c0_34 = arith.constant 0 : index
    %c0_35 = arith.constant 0 : index
    %34 = vector.load %arg6[%c0_34, %c0_35] : memref<8x324xf32, #tpu.memory_space<vmem>>, vector<8x324xf32>
    %cst_36 = arith.constant 0.000000e+00 : f32
    %35 = vector.broadcast %cst_36 : f32 to vector<16x286xf32>
    %36 = vector.extract_strided_slice %34 {offsets = [0, 0], sizes = [8, 286], strides = [1, 1]} : vector<8x324xf32> to vector<8x286xf32>
    %c0_37 = arith.constant 0 : index
    %c0_38 = arith.constant 0 : index
    %37 = vector.load %arg1[%c0_37, %c0_38] : memref<144x8xf32, #tpu.memory_space<vmem>>, vector<16x8xf32>
    %cst_39 = arith.constant dense<0.000000e+00> : vector<16x286xf32>
    %38 = tpu.matmul %37, %36, %cst_39 {dimension_numbers = #tpu.dot_dimension_numbers<[1], [0], [0], [1], [0, 0, 1, 1], [], []>} : vector<16x8xf32>, vector<8x286xf32>, vector<16x286xf32> -> vector<16x286xf32>
    %39 = arith.addf %35, %38 : vector<16x286xf32>
    %40 = vector.extract_strided_slice %34 {offsets = [0, 1], sizes = [8, 286], strides = [1, 1]} : vector<8x324xf32> to vector<8x286xf32>
    %c16_40 = arith.constant 16 : index
    %c0_41 = arith.constant 0 : index
    %41 = vector.load %arg1[%c16_40, %c0_41] : memref<144x8xf32, #tpu.memory_space<vmem>>, vector<16x8xf32>
    %cst_42 = arith.constant dense<0.000000e+00> : vector<16x286xf32>
    %42 = tpu.matmul %41, %40, %cst_42 {dimension_numbers = #tpu.dot_dimension_numbers<[1], [0], [0], [1], [0, 0, 1, 1], [], []>} : vector<16x8xf32>, vector<8x286xf32>, vector<16x286xf32> -> vector<16x286xf32>
    %43 = arith.addf %39, %42 : vector<16x286xf32>
    %44 = vector.extract_strided_slice %34 {offsets = [0, 2], sizes = [8, 286], strides = [1, 1]} : vector<8x324xf32> to vector<8x286xf32>
    %c32_43 = arith.constant 32 : index
    %c0_44 = arith.constant 0 : index
    %45 = vector.load %arg1[%c32_43, %c0_44] : memref<144x8xf32, #tpu.memory_space<vmem>>, vector<16x8xf32>
    %cst_45 = arith.constant dense<0.000000e+00> : vector<16x286xf32>
    %46 = tpu.matmul %45, %44, %cst_45 {dimension_numbers = #tpu.dot_dimension_numbers<[1], [0], [0], [1], [0, 0, 1, 1], [], []>} : vector<16x8xf32>, vector<8x286xf32>, vector<16x286xf32> -> vector<16x286xf32>
    %47 = arith.addf %43, %46 : vector<16x286xf32>
    %48 = vector.extract_strided_slice %34 {offsets = [0, 18], sizes = [8, 286], strides = [1, 1]} : vector<8x324xf32> to vector<8x286xf32>
    %c48_46 = arith.constant 48 : index
    %c0_47 = arith.constant 0 : index
    %49 = vector.load %arg1[%c48_46, %c0_47] : memref<144x8xf32, #tpu.memory_space<vmem>>, vector<16x8xf32>
    %cst_48 = arith.constant dense<0.000000e+00> : vector<16x286xf32>
    %50 = tpu.matmul %49, %48, %cst_48 {dimension_numbers = #tpu.dot_dimension_numbers<[1], [0], [0], [1], [0, 0, 1, 1], [], []>} : vector<16x8xf32>, vector<8x286xf32>, vector<16x286xf32> -> vector<16x286xf32>
    %51 = arith.addf %47, %50 : vector<16x286xf32>
    %52 = vector.extract_strided_slice %34 {offsets = [0, 19], sizes = [8, 286], strides = [1, 1]} : vector<8x324xf32> to vector<8x286xf32>
    %c64_49 = arith.constant 64 : index
    %c0_50 = arith.constant 0 : index
    %53 = vector.load %arg1[%c64_49, %c0_50] : memref<144x8xf32, #tpu.memory_space<vmem>>, vector<16x8xf32>
    %cst_51 = arith.constant dense<0.000000e+00> : vector<16x286xf32>
    %54 = tpu.matmul %53, %52, %cst_51 {dimension_numbers = #tpu.dot_dimension_numbers<[1], [0], [0], [1], [0, 0, 1, 1], [], []>} : vector<16x8xf32>, vector<8x286xf32>, vector<16x286xf32> -> vector<16x286xf32>
    %55 = arith.addf %51, %54 : vector<16x286xf32>
    %56 = vector.extract_strided_slice %34 {offsets = [0, 20], sizes = [8, 286], strides = [1, 1]} : vector<8x324xf32> to vector<8x286xf32>
    %c80_52 = arith.constant 80 : index
    %c0_53 = arith.constant 0 : index
    %57 = vector.load %arg1[%c80_52, %c0_53] : memref<144x8xf32, #tpu.memory_space<vmem>>, vector<16x8xf32>
    %cst_54 = arith.constant dense<0.000000e+00> : vector<16x286xf32>
    %58 = tpu.matmul %57, %56, %cst_54 {dimension_numbers = #tpu.dot_dimension_numbers<[1], [0], [0], [1], [0, 0, 1, 1], [], []>} : vector<16x8xf32>, vector<8x286xf32>, vector<16x286xf32> -> vector<16x286xf32>
    %59 = arith.addf %55, %58 : vector<16x286xf32>
    %60 = vector.extract_strided_slice %34 {offsets = [0, 36], sizes = [8, 286], strides = [1, 1]} : vector<8x324xf32> to vector<8x286xf32>
    %c96_55 = arith.constant 96 : index
    %c0_56 = arith.constant 0 : index
    %61 = vector.load %arg1[%c96_55, %c0_56] : memref<144x8xf32, #tpu.memory_space<vmem>>, vector<16x8xf32>
    %cst_57 = arith.constant dense<0.000000e+00> : vector<16x286xf32>
    %62 = tpu.matmul %61, %60, %cst_57 {dimension_numbers = #tpu.dot_dimension_numbers<[1], [0], [0], [1], [0, 0, 1, 1], [], []>} : vector<16x8xf32>, vector<8x286xf32>, vector<16x286xf32> -> vector<16x286xf32>
    %63 = arith.addf %59, %62 : vector<16x286xf32>
    %64 = vector.extract_strided_slice %34 {offsets = [0, 37], sizes = [8, 286], strides = [1, 1]} : vector<8x324xf32> to vector<8x286xf32>
    %c112_58 = arith.constant 112 : index
    %c0_59 = arith.constant 0 : index
    %65 = vector.load %arg1[%c112_58, %c0_59] : memref<144x8xf32, #tpu.memory_space<vmem>>, vector<16x8xf32>
    %cst_60 = arith.constant dense<0.000000e+00> : vector<16x286xf32>
    %66 = tpu.matmul %65, %64, %cst_60 {dimension_numbers = #tpu.dot_dimension_numbers<[1], [0], [0], [1], [0, 0, 1, 1], [], []>} : vector<16x8xf32>, vector<8x286xf32>, vector<16x286xf32> -> vector<16x286xf32>
    %67 = arith.addf %63, %66 : vector<16x286xf32>
    %68 = vector.extract_strided_slice %34 {offsets = [0, 38], sizes = [8, 286], strides = [1, 1]} : vector<8x324xf32> to vector<8x286xf32>
    %c128_61 = arith.constant 128 : index
    %c0_62 = arith.constant 0 : index
    %69 = vector.load %arg1[%c128_61, %c0_62] : memref<144x8xf32, #tpu.memory_space<vmem>>, vector<16x8xf32>
    %cst_63 = arith.constant dense<0.000000e+00> : vector<16x286xf32>
    %70 = tpu.matmul %69, %68, %cst_63 {dimension_numbers = #tpu.dot_dimension_numbers<[1], [0], [0], [1], [0, 0, 1, 1], [], []>} : vector<16x8xf32>, vector<8x286xf32>, vector<16x286xf32> -> vector<16x286xf32>
    %71 = arith.addf %67, %70 : vector<16x286xf32>
    %c0_64 = arith.constant 0 : index
    %c0_65 = arith.constant 0 : index
    %72 = vector.load %arg2[%c0_64, %c0_65] : memref<16x1xf32, #tpu.memory_space<vmem>>, vector<16x1xf32>
    %73 = vector.broadcast %72 : vector<16x1xf32> to vector<16x286xf32>
    %74 = arith.addf %71, %73 : vector<16x286xf32>
    %cst_66 = arith.constant 0.000000e+00 : f32
    %75 = vector.broadcast %cst_66 : f32 to vector<16x286xf32>
    %76 = arith.maximumf %74, %75 : vector<16x286xf32>
    %77 = vector.extract_strided_slice %76 {offsets = [0, 0], sizes = [16, 285], strides = [1, 1]} : vector<16x286xf32> to vector<16x285xf32>
    %78 = vector.extract_strided_slice %76 {offsets = [0, 1], sizes = [16, 285], strides = [1, 1]} : vector<16x286xf32> to vector<16x285xf32>
    %79 = arith.maximumf %77, %78 : vector<16x285xf32>
    %80 = vector.extract_strided_slice %79 {offsets = [0, 0], sizes = [16, 267], strides = [1, 1]} : vector<16x285xf32> to vector<16x267xf32>
    %81 = vector.extract_strided_slice %79 {offsets = [0, 18], sizes = [16, 267], strides = [1, 1]} : vector<16x285xf32> to vector<16x267xf32>
    %82 = arith.maximumf %80, %81 : vector<16x267xf32>
    %c0_67 = arith.constant 0 : index
    %c0_68 = arith.constant 0 : index
    %83 = vector.load %arg4[%c0_67, %c0_68] : memref<2x10xf32, #tpu.memory_space<vmem>>, vector<2x10xf32>
    %84 = vector.extract_strided_slice %82 {offsets = [0, 0], sizes = [2, 267], strides = [1, 1]} : vector<16x267xf32> to vector<2x267xf32>
    %c0_69 = arith.constant 0 : index
    %c0_70 = arith.constant 0 : index
    %c0_71 = arith.constant 0 : index
    %85 = vector.load %arg3[%c0_69, %c0_70, %c0_71] : memref<8x267x10xf32, #tpu.memory_space<vmem>>, vector<1x267x10xf32>
    %86 = vector.shape_cast %85 : vector<1x267x10xf32> to vector<267x10xf32>
    %cst_72 = arith.constant dense<0.000000e+00> : vector<2x10xf32>
    %87 = tpu.matmul %84, %86, %cst_72 {dimension_numbers = #tpu.dot_dimension_numbers<[1], [0], [0], [1], [0, 0, 1, 1], [], []>} : vector<2x267xf32>, vector<267x10xf32>, vector<2x10xf32> -> vector<2x10xf32>
    %88 = arith.addf %83, %87 : vector<2x10xf32>
    %89 = vector.extract_strided_slice %82 {offsets = [2, 0], sizes = [2, 267], strides = [1, 1]} : vector<16x267xf32> to vector<2x267xf32>
    %c1 = arith.constant 1 : index
    %c0_73 = arith.constant 0 : index
    %c0_74 = arith.constant 0 : index
    %90 = vector.load %arg3[%c1, %c0_73, %c0_74] : memref<8x267x10xf32, #tpu.memory_space<vmem>>, vector<1x267x10xf32>
    %91 = vector.shape_cast %90 : vector<1x267x10xf32> to vector<267x10xf32>
    %cst_75 = arith.constant dense<0.000000e+00> : vector<2x10xf32>
    %92 = tpu.matmul %89, %91, %cst_75 {dimension_numbers = #tpu.dot_dimension_numbers<[1], [0], [0], [1], [0, 0, 1, 1], [], []>} : vector<2x267xf32>, vector<267x10xf32>, vector<2x10xf32> -> vector<2x10xf32>
    %93 = arith.addf %88, %92 : vector<2x10xf32>
    %94 = vector.extract_strided_slice %82 {offsets = [4, 0], sizes = [2, 267], strides = [1, 1]} : vector<16x267xf32> to vector<2x267xf32>
    %c2 = arith.constant 2 : index
    %c0_76 = arith.constant 0 : index
    %c0_77 = arith.constant 0 : index
    %95 = vector.load %arg3[%c2, %c0_76, %c0_77] : memref<8x267x10xf32, #tpu.memory_space<vmem>>, vector<1x267x10xf32>
    %96 = vector.shape_cast %95 : vector<1x267x10xf32> to vector<267x10xf32>
    %cst_78 = arith.constant dense<0.000000e+00> : vector<2x10xf32>
    %97 = tpu.matmul %94, %96, %cst_78 {dimension_numbers = #tpu.dot_dimension_numbers<[1], [0], [0], [1], [0, 0, 1, 1], [], []>} : vector<2x267xf32>, vector<267x10xf32>, vector<2x10xf32> -> vector<2x10xf32>
    %98 = arith.addf %93, %97 : vector<2x10xf32>
    %99 = vector.extract_strided_slice %82 {offsets = [6, 0], sizes = [2, 267], strides = [1, 1]} : vector<16x267xf32> to vector<2x267xf32>
    %c3 = arith.constant 3 : index
    %c0_79 = arith.constant 0 : index
    %c0_80 = arith.constant 0 : index
    %100 = vector.load %arg3[%c3, %c0_79, %c0_80] : memref<8x267x10xf32, #tpu.memory_space<vmem>>, vector<1x267x10xf32>
    %101 = vector.shape_cast %100 : vector<1x267x10xf32> to vector<267x10xf32>
    %cst_81 = arith.constant dense<0.000000e+00> : vector<2x10xf32>
    %102 = tpu.matmul %99, %101, %cst_81 {dimension_numbers = #tpu.dot_dimension_numbers<[1], [0], [0], [1], [0, 0, 1, 1], [], []>} : vector<2x267xf32>, vector<267x10xf32>, vector<2x10xf32> -> vector<2x10xf32>
    %103 = arith.addf %98, %102 : vector<2x10xf32>
    %104 = vector.extract_strided_slice %82 {offsets = [8, 0], sizes = [2, 267], strides = [1, 1]} : vector<16x267xf32> to vector<2x267xf32>
    %c4 = arith.constant 4 : index
    %c0_82 = arith.constant 0 : index
    %c0_83 = arith.constant 0 : index
    %105 = vector.load %arg3[%c4, %c0_82, %c0_83] : memref<8x267x10xf32, #tpu.memory_space<vmem>>, vector<1x267x10xf32>
    %106 = vector.shape_cast %105 : vector<1x267x10xf32> to vector<267x10xf32>
    %cst_84 = arith.constant dense<0.000000e+00> : vector<2x10xf32>
    %107 = tpu.matmul %104, %106, %cst_84 {dimension_numbers = #tpu.dot_dimension_numbers<[1], [0], [0], [1], [0, 0, 1, 1], [], []>} : vector<2x267xf32>, vector<267x10xf32>, vector<2x10xf32> -> vector<2x10xf32>
    %108 = arith.addf %103, %107 : vector<2x10xf32>
    %109 = vector.extract_strided_slice %82 {offsets = [10, 0], sizes = [2, 267], strides = [1, 1]} : vector<16x267xf32> to vector<2x267xf32>
    %c5 = arith.constant 5 : index
    %c0_85 = arith.constant 0 : index
    %c0_86 = arith.constant 0 : index
    %110 = vector.load %arg3[%c5, %c0_85, %c0_86] : memref<8x267x10xf32, #tpu.memory_space<vmem>>, vector<1x267x10xf32>
    %111 = vector.shape_cast %110 : vector<1x267x10xf32> to vector<267x10xf32>
    %cst_87 = arith.constant dense<0.000000e+00> : vector<2x10xf32>
    %112 = tpu.matmul %109, %111, %cst_87 {dimension_numbers = #tpu.dot_dimension_numbers<[1], [0], [0], [1], [0, 0, 1, 1], [], []>} : vector<2x267xf32>, vector<267x10xf32>, vector<2x10xf32> -> vector<2x10xf32>
    %113 = arith.addf %108, %112 : vector<2x10xf32>
    %114 = vector.extract_strided_slice %82 {offsets = [12, 0], sizes = [2, 267], strides = [1, 1]} : vector<16x267xf32> to vector<2x267xf32>
    %c6 = arith.constant 6 : index
    %c0_88 = arith.constant 0 : index
    %c0_89 = arith.constant 0 : index
    %115 = vector.load %arg3[%c6, %c0_88, %c0_89] : memref<8x267x10xf32, #tpu.memory_space<vmem>>, vector<1x267x10xf32>
    %116 = vector.shape_cast %115 : vector<1x267x10xf32> to vector<267x10xf32>
    %cst_90 = arith.constant dense<0.000000e+00> : vector<2x10xf32>
    %117 = tpu.matmul %114, %116, %cst_90 {dimension_numbers = #tpu.dot_dimension_numbers<[1], [0], [0], [1], [0, 0, 1, 1], [], []>} : vector<2x267xf32>, vector<267x10xf32>, vector<2x10xf32> -> vector<2x10xf32>
    %118 = arith.addf %113, %117 : vector<2x10xf32>
    %119 = vector.extract_strided_slice %82 {offsets = [14, 0], sizes = [2, 267], strides = [1, 1]} : vector<16x267xf32> to vector<2x267xf32>
    %c7 = arith.constant 7 : index
    %c0_91 = arith.constant 0 : index
    %c0_92 = arith.constant 0 : index
    %120 = vector.load %arg3[%c7, %c0_91, %c0_92] : memref<8x267x10xf32, #tpu.memory_space<vmem>>, vector<1x267x10xf32>
    %121 = vector.shape_cast %120 : vector<1x267x10xf32> to vector<267x10xf32>
    %cst_93 = arith.constant dense<0.000000e+00> : vector<2x10xf32>
    %122 = tpu.matmul %119, %121, %cst_93 {dimension_numbers = #tpu.dot_dimension_numbers<[1], [0], [0], [1], [0, 0, 1, 1], [], []>} : vector<2x267xf32>, vector<267x10xf32>, vector<2x10xf32> -> vector<2x10xf32>
    %123 = arith.addf %118, %122 : vector<2x10xf32>
    %c0_94 = arith.constant 0 : index
    %c0_95 = arith.constant 0 : index
    %124 = vector.load %arg5[%c0_94, %c0_95] : memref<2x10xf32, #tpu.memory_space<vmem>>, vector<2x10xf32>
    tpu.vector_store %arg5[%c0_94, %c0_95], %123 {strides = array<i32>} : memref<2x10xf32, #tpu.memory_space<vmem>>, vector<2x10xf32>,
    return
  }
}

</mosaic_0001>

<bundles_post_ra>
// kernel: net_forward_impl.1
= control target key start
LH: loop header
LB: loop body
LE: loop exit
PB: predicated region body
PF: predicated region fallthrough
CT: control target
= control target key end

     0   :  { %s4476_s20 = smov 31   ;;  %s4477_s21 = smov 19   ;;  %v4478_v1 = vmov 0.0   ;;  %s5669_s0 = inlined_call_operand.vmem [shape: f32[8,256], index: 0, kind: input, shape index: {}]   ;;  %s5670_s1 = inlined_call_operand.vmem [shape: f32[144,8], index: 1, kind: input, shape index: {}]   ;;  %s5671_s2 = inlined_call_operand.vmem [shape: f32[16,1], index: 2, kind: input, shape index: {}]   ;;  %s5672_s3 = inlined_call_operand.vmem [shape: f32[8,267,10], index: 3, kind: input, shape index: {}]   ;;  %s5673_s4 = inlined_call_operand.vmem [shape: f32[2,10], index: 4, kind: input, shape index: {}]   ;;  %s5674_s5 = inlined_call_operand.hbm [shape: f32[2,10], index: 5, kind: output, shape index: {}]  }
   0x1   :  { %v67_v0 = vld [vmem:[%s5669_s0] sm:$0xff]  ;;  %22 = vst [vmem:[#allocation2 + $0x8] sm:$0xff] %v4478_v1  ;;  %21 = vst [vmem:[#allocation2] sm:$0xff] %v4478_v1  ;;  %v83_v2 = vld [vmem:[%s5669_s0 + $0x8] sm:$0xff]  ;;  %234 = vmatprep.mubr.f32.mxu0 %v4478_v1 }
   0x2   :  { %69 = vrot.lane.b32.xlu0 %v67_v0, %s4476_s20  ;;  %27 = vrot.lane.b32.xlu1 %v67_v0, %s4477_s21 }
   0x3   :  { %10 = vsyncpa [#allocation4], 0  ;;  %s4479_s24 = smov 33   ;;  %s4480_s25 = smov 35   ;;  %vm23_vm0 = vcmask 556032   ;;  %vm74_vm1 = vcmask 121856  }
   0x4   :  { %24 = vst.msk [vmem:[#allocation2 + $0x10] sm:$0xff] %vm23_vm0, %v4478_v1  ;;  %s4481_s26 = smov 21   ;;  %s4482_s27 = smov 37   ;;  %vm30_vm2 = vcmask 285848   ;;  %vm81_vm3 = vcmask 269448   ;;  %vm88_vm4 = vcmask 417048  }
   0x5   :  { %s4483_s28 = smov 23   ;;  %s4484_s29 = smov 39   ;;  %vm37_vm5 = vcmask 433448   ;;  %vm95_vm6 = vcmask 564648   ;;  %vm44_vm7 = vcmask 581048   ;;  %vm102_vm8 = vcmask 712248  }
   0x6   :  { %78 = vrot.lane.b32.xlu0 %v67_v0, %s4479_s24  ;;  %85 = vrot.lane.b32.xlu1 %v83_v2, %s4480_s25  ;;  %s4485_s30 = smov 25   ;;  %s4486_s0 = smov 41   ;;  %vm51_vm9 = vcmask 728648   ;;  %vm109_vm10 = vcmask 859848   ;;  %vm125_vm11 = vcmask 105472   ;;  %vm58_vm12 = vcmask 876248  }
   0x7   :  { %s4487_s6 = smov 45   ;;  %s4488_s7 = smov 27   ;;  %vm116_vm13 = vcmask 1007448   ;;  %vm132_vm14 = vcmask 253048   ;;  %vm123_vm15 = vcmask 1048552   ;;  %v4549_v17 = vld [vmem:[%s5670_s1 + $0x10] sm:$0xff] }
   0x8   :  { %s4489_s8 = smov 43   ;;  %s4490_s9 = smov 47   ;;  %vm163_vm0 = vcmask 64512   ;;  %v1726_v23 = vld [vmem:[%s5671_s2] sm:$0xff]  ;;  %v4501_v24 = vmov 0   ;;  %v1727_v25 = vld [vmem:[%s5671_s2 + $0x8] sm:$0xff] }
   0x9   :  { %s4491_s10 = smov 29   ;;  %s4492_s11 = smov 49   ;;  %3943 = vmatprep.mubr.msk.f32.mxu1 %vm163_vm0, %v4549_v17  ;;  %4431 = vset.pattern.permute.xlu0 %v4501_v24  ;;  %v147_v28 = vld [vmem:[%s5670_s1 + $0x18] sm:$0xff]  ;;  %v144_v34 = vld [vmem:[%s5670_s1] sm:$0xff]  ;;  %v145_v37 = vld [vmem:[%s5670_s1 + $0x8] sm:$0xff] }
   0xa   :  { %34 = vrot.lane.b32.xlu0 %v67_v0, %s4481_s26  ;;  %92 = vrot.lane.b32.xlu1 %v83_v2, %s4482_s27  ;;  %s4493_s14 = smov 127   ;;  %s4494_s15 = smov 126   ;;  %v480_v41 = vld [vmem:[%s5670_s1 + $0x20] sm:$0xff]  ;;  %v481_v45 = vld [vmem:[%s5670_s1 + $0x28] sm:$0xff] }
   0xb   :  { %s4495_s16 = smov 110   ;;  %s4496_s17 = smov 109   ;;  %v658_v49 = vld [vmem:[%s5670_s1 + $0x30] sm:$0xff]  ;;  %v659_v53 = vld [vmem:[%s5670_s1 + $0x38] sm:$0xff]  ;;  %v836_v56 = vld [vmem:[%s5670_s1 + $0x40] sm:$0xff] }
   0xc   :  { %s4497_s18 = smov 108   ;;  %s4498_s19 = smov 92   ;;  %v837_v60 = vld [vmem:[%s5670_s1 + $0x48] sm:$0xff]  ;;  %v1014_v63 = vld [vmem:[%s5670_s1 + $0x50] sm:$0xff] }
   0xd   :  { %s4499_s20 = smov 91   ;;  %s4500_s21 = smov 90  }
   0xe   :  { %41 = vrot.lane.b32.xlu0 %v67_v0, %s4483_s28  ;;  %99 = vrot.lane.b32.xlu1 %v83_v2, %s4484_s29 }
  0x12   :  { %48 = vrot.lane.b32.xlu0 %v67_v0, %s4485_s30  ;;  %106 = vrot.lane.b32.xlu1 %v83_v2, %s4486_s0 }
  0x16   :  { %120 = vrot.lane.b32.xlu0 %v83_v2, %s4487_s6  ;;  %55 = vrot.lane.b32.xlu1 %v67_v0, %s4488_s7 }
  0x1a   :  { %113 = vrot.lane.b32.xlu0 %v83_v2, %s4489_s8  ;;  %129 = vrot.lane.b32.xlu1 %v83_v2, %s4490_s9 }
  0x1e   :  { %62 = vrot.lane.b32.xlu0 %v67_v0, %s4491_s10  ;;  %136 = vrot.lane.b32.xlu1 %v83_v2, %s4492_s11 }
  0x74   :  { %v70_v3 = vpop.permute.xlu0 %69  ;;  %v28_v4 = vpop.permute.xlu1 %27 }
  0x75   :  { %75 = vst.msk [vmem:[#allocation2 + $0x8] sm:$0xff] %vm74_vm1, %v70_v3  ;;  %vm65_vm1 = vcmask 1023848  }
  0x76   :  { %31 = vst.msk [vmem:[#allocation2] sm:$0xff] %vm30_vm2, %v28_v4  ;;  %vm139_vm2 = vcmask 400648  }
  0x78   :  { %v79_v5 = vpop.permute.xlu0 %78  ;;  %v86_v6 = vpop.permute.xlu1 %85 }
  0x79   :  { %82 = vst.msk [vmem:[#allocation2 + $0x8] sm:$0xff] %vm81_vm3, %v79_v5  ;;  %vm72_vm3 = vcmask 1048568  }
  0x7a   :  { %89 = vst.msk [vmem:[#allocation2 + $0x8] sm:$0xff] %vm88_vm4, %v86_v6  ;;  %vm157_vm4 = vcmask 1039360  }
  0x7c   :  { %v35_v7 = vpop.permute.xlu0 %34  ;;  %v93_v8 = vpop.permute.xlu1 %92 }
  0x7d   :  { %38 = vst.msk [vmem:[#allocation2] sm:$0xff] %vm37_vm5, %v35_v7  ;;  %vm488_vm5 = vcmask 1031168   ;;  %v1192_v7 = vld [vmem:[%s5670_s1 + $0x60] sm:$0xff] }
  0x7e   :  { %96 = vst.msk [vmem:[#allocation2 + $0x8] sm:$0xff] %vm95_vm6, %v93_v8  ;;  %vm666_vm6 = vcmask 900096  }
  0x80   :  { %v42_v9 = vpop.permute.xlu0 %41  ;;  %v100_v10 = vpop.permute.xlu1 %99 }
  0x81   :  { %45 = vst.msk [vmem:[#allocation2] sm:$0xff] %vm44_vm7, %v42_v9  ;;  %vm844_vm7 = vcmask 891904   ;;  %v1193_v9 = vld [vmem:[%s5670_s1 + $0x68] sm:$0xff] }
  0x82   :  { %103 = vst.msk [vmem:[#allocation2 + $0x8] sm:$0xff] %vm102_vm8, %v100_v10  ;;  %vm1022_vm8 = vcmask 883712  }
  0x84   :  { %v49_v11 = vpop.permute.xlu0 %48  ;;  %v107_v12 = vpop.permute.xlu1 %106 }
  0x85   :  { %52 = vst.msk [vmem:[#allocation2] sm:$0xff] %vm51_vm9, %v49_v11  ;;  %vm1200_vm9 = vcmask 752640  }
  0x86   :  { %110 = vst.msk [vmem:[#allocation2 + $0x8] sm:$0xff] %vm109_vm10, %v107_v12  ;;  %vm1378_vm10 = vcmask 744448  }
  0x88   :  { %v121_v13 = vpop.permute.xlu0 %120  ;;  %v56_v14 = vpop.permute.xlu1 %55 }
  0x89   :  { %126 = vst.msk [vmem:[#allocation2 + $0x10] sm:$0xff] %vm125_vm11, %v121_v13  ;;  %vm1556_vm11 = vcmask 736256  }
  0x8a   :  { %59 = vst.msk [vmem:[#allocation2] sm:$0xff] %vm58_vm12, %v56_v14  ;;  %vm1857_vm12 = vcmask 1042432  }
  0x8c   :  { %v114_v15 = vpop.permute.xlu0 %113  ;;  %v130_v16 = vpop.permute.xlu1 %129 }
  0x8d   :  { %117 = vst.msk [vmem:[#allocation2 + $0x8] sm:$0xff] %vm116_vm13, %v114_v15  ;;  %v1371_v15 = vld [vmem:[%s5670_s1 + $0x78] sm:$0xff]  ;;  %vm4503_vm13 = vmmov 1  }
  0x8e   :  { %133 = vst.msk [vmem:[#allocation2 + $0x10] sm:$0xff] %vm132_vm14, %v130_v16  ;;  %vm4957_vm14 = vmpackc.low %vm1857_vm12, %vm4503_vm13 }
  0x8f   :  { %124 = vst.msk [vmem:[#allocation2 + $0x8] sm:$0xff] %vm123_vm15, %v121_v13  ;;  %v1370_v13 = vld [vmem:[%s5670_s1 + $0x70] sm:$0xff]  ;;  %vm1853_vm15 = vcmask 89088  }
  0x90   :  { %v63_v18 = vpop.permute.xlu0 %62  ;;  %v137_v19 = vpop.permute.xlu1 %136 }
  0x91   :  { %66 = vst.msk [vmem:[#allocation2] sm:$0xff] %vm65_vm1, %v63_v18  ;;  %vm3304_vm1 = vcmask 74752  }
  0x92   :  { %140 = vst.msk [vmem:[#allocation2 + $0x10] sm:$0xff] %vm139_vm2, %v137_v19  ;;  %v1549_v19 = vld [vmem:[%s5670_s1 + $0x88] sm:$0xff] }
  0x93   :  { %73 = vst.msk [vmem:[#allocation2] sm:$0xff] %vm72_vm3, %v70_v3  ;;  %v1015_v3 = vld [vmem:[%s5670_s1 + $0x58] sm:$0xff] }
  0x96   :  { %v142_v20 = vld [vmem:[#allocation2 + $0x8] sm:$0xff] }
  0x97   :  { %153 = vrot.lane.b32.xlu0 %v142_v20, %s4493_s14 }
  0x99   :  { %v143_v21 = vld [vmem:[#allocation2 + $0x10] sm:$0xff] }
  0x9a   :  { %155 = vrot.lane.b32.xlu1 %v143_v21, %s4493_s14  ;;  %v141_v22 = vld [vmem:[#allocation2] sm:$0xff] }
  0x9b   :  { %151 = vrot.lane.b32.xlu0 %v141_v22, %s4493_s14 }
  0x9e   :  { %484 = vrot.lane.b32.xlu1 %v142_v20, %s4494_s15 }
  0x9f   :  { %486 = vrot.lane.b32.xlu0 %v143_v21, %s4494_s15 }
  0xa2   :  { %482 = vrot.lane.b32.xlu1 %v141_v22, %s4494_s15 }
  0xa3   :  { %662 = vrot.lane.b32.xlu0 %v142_v20, %s4495_s16 }
  0xa6   :  { %664 = vrot.lane.b32.xlu1 %v143_v21, %s4495_s16 }
  0xa7   :  { %660 = vrot.lane.b32.xlu0 %v141_v22, %s4495_s16 }
  0xaa   :  { %840 = vrot.lane.b32.xlu1 %v142_v20, %s4496_s17 }
  0xab   :  { %842 = vrot.lane.b32.xlu0 %v143_v21, %s4496_s17 }
  0xae   :  { %838 = vrot.lane.b32.xlu1 %v141_v22, %s4496_s17 }
  0xaf   :  { %1018 = vrot.lane.b32.xlu0 %v142_v20, %s4497_s18 }
  0xb2   :  { %1020 = vrot.lane.b32.xlu1 %v143_v21, %s4497_s18 }
  0xb3   :  { %1016 = vrot.lane.b32.xlu0 %v141_v22, %s4497_s18 }
  0xb6   :  { %1196 = vrot.lane.b32.xlu1 %v142_v20, %s4498_s19 }
  0xb7   :  { %1198 = vrot.lane.b32.xlu0 %v143_v21, %s4498_s19 }
  0xba   :  { %1194 = vrot.lane.b32.xlu1 %v141_v22, %s4498_s19 }
  0xbb   :  { %1374 = vrot.lane.b32.xlu0 %v142_v20, %s4499_s20 }
  0xbe   :  { %1376 = vrot.lane.b32.xlu1 %v143_v21, %s4499_s20 }
  0xbf   :  { %1372 = vrot.lane.b32.xlu0 %v141_v22, %s4499_s20 }
  0xc2   :  { %1552 = vrot.lane.b32.xlu1 %v142_v20, %s4500_s21 }
  0xc3   :  { %1554 = vrot.lane.b32.xlu0 %v143_v21, %s4500_s21 }
  0xc6   :  { %1550 = vrot.lane.b32.xlu1 %v141_v22, %s4500_s21 }
  0xc7   :  { %1730 = vperm.xlu0 %4431, %v1726_v23  }
  0xcb   :  { %1735 = vperm.xlu0 %4431, %v1727_v25  }
 0x109   :  { %v154_v26 = vpop.permute.xlu0 %153 }
 0x10c   :  { %v156_v27 = vpop.permute.xlu1 %155 }
 0x10d   :  { %3941 = vmatprep.subr.mxu1 %v156_v27  ;;  %v152_v29 = vpop.permute.xlu0 %151  ;;  %v159_v30 = vsel %vm157_vm4, %v154_v26, %v156_v27 }
 0x10e   :  { %170 = vmatprep.subr.mxu0 %v159_v30  ;;  %3942 = vmatpush3.msra.mxu1 %v156_v27  ;;  %v158_v31 = vsel %vm157_vm4, %v152_v29, %v154_v26 }
 0x10f   :  { %171 = vmatpush1.msra.mxu0 %v158_v31  ;;  %3944 = vmatmul.mubr.msk.f32.vlgmr.msra.gmra.mrb[0].mxu1 %vm163_vm0, %v147_v28 }
 0x110   :  { %3946 = vmatprep.subr.mxu1 %v143_v21  ;;  %v485_v32 = vpop.permute.xlu1 %484  ;;  %3320 = vmatmul.mubr.msk.f32.vlgmr.msra.gmra.mrb[0].mxu0 %vm163_vm0, %v4549_v17  ;;  %v1548_v17 = vld [vmem:[%s5670_s1 + $0x80] sm:$0xff] }
 0x111   :  { %3947 = vmatpush3.msra.mxu1 %v143_v21  ;;  %328 = vmatprep.subr.mxu0 %v142_v20  ;;  %v487_v33 = vpop.permute.xlu0 %486 }
 0x112   :  { %329 = vmatpush1.msra.mxu0 %v141_v22  ;;  %3951 = vmatprep.subr.mxu1 %v487_v33  ;;  %v490_v35 = vsel %vm488_vm5, %v485_v32, %v487_v33 }
 0x113   :  { %240 = vmatprep.mubr.f32.mxu0 %v4478_v1  ;;  %500 = vmatprep.subr.mxu0 %v490_v35  ;;  %v1819_v35 = vld [vmem:[%s5672_s3] sm:$0xff] }
 0x114   :  { %v483_v36 = vpop.permute.xlu1 %482  ;;  %3321 = vmatmul.mubr.msk.f32.gmra.mrb[2].mxu0 %vm163_vm0, %v147_v28  ;;  %3948 = vmatprep.mubr.msk.f32.mxu1 %vm163_vm0, %v144_v34 }
 0x115   :  { %v663_v38 = vpop.permute.xlu0 %662  ;;  %392 = vmatprep.mubr.f32.mxu0 %v4478_v1  ;;  %v489_v39 = vsel %vm488_vm5, %v483_v36, %v485_v32 }
 0x117   :  { %3949 = vmatmul.mubr.msk.f32.vlgmr.msra.gmra.mrb[0].mxu1 %vm163_vm0, %v145_v37 }
 0x118   :  { %3952 = vmatpush3.msra.mxu1 %v487_v33  ;;  %v665_v40 = vpop.permute.xlu1 %664  ;;  %3324 = vmatmul.mubr.msk.f32.vlgmr.msra.gmra.mrb[0].mxu0 %vm163_vm0, %v144_v34  ;;  %v1835_v33 = vld [vmem:[%s5672_s3 + $0x80] sm:$0xff]  ;;  %v1836_v34 = vld [vmem:[%s5672_s3 + $0x88] sm:$0xff] }
 0x119   :  { %501 = vmatpush1.msra.mxu0 %v489_v39  ;;  %3956 = vmatprep.subr.mxu1 %v665_v40  ;;  %v661_v42 = vpop.permute.xlu0 %660  ;;  %v668_v43 = vsel %vm666_vm6, %v663_v38, %v665_v40  ;;  %v4042_v36 = vpack.c.bf16 %v1836_v34, %v1835_v33  ;;  %v3375_v39 = vld [vmem:[%s5672_s3 + $0x198] sm:$0xff]  ;;  %v1845_v34 = vld [vmem:[%s5672_s3 + $0xd0] sm:$0xff] }
 0x11a   :  { %678 = vmatprep.subr.mxu0 %v668_v43  ;;  %398 = vmatprep.mubr.f32.mxu0 %v4478_v1  ;;  %v667_v47 = vsel %vm666_vm6, %v661_v42, %v663_v38  ;;  %v3374_v38 = vld [vmem:[%s5672_s3 + $0x190] sm:$0xff] }
 0x11b   :  { %3953 = vmatprep.mubr.msk.f32.mxu1 %vm163_vm0, %v480_v41  ;;  %v4078_v42 = vpack.c.bf16 %v3375_v39, %v3374_v38  ;;  %v3358_v43 = vld [vmem:[%s5672_s3 + $0x110] sm:$0xff]  ;;  %v3367_v38 = vld [vmem:[%s5672_s3 + $0x158] sm:$0xff] }
 0x11c   :  { %v841_v44 = vpop.permute.xlu1 %840  ;;  %3325 = vmatmul.mubr.msk.f32.gmra.mrb[2].mxu0 %vm163_vm0, %v145_v37  ;;  %v1820_v37 = vld [vmem:[%s5672_s3 + $0x8] sm:$0xff] }
 0x11d   :  { %v843_v46 = vpop.permute.xlu0 %842  ;;  %564 = vmatprep.mubr.f32.mxu0 %v4478_v1 }
 0x11e   :  { %v846_v50 = vsel %vm844_vm7, %v841_v44, %v843_v46 }
 0x11f   :  { %3954 = vmatmul.mubr.msk.f32.vlgmr.msra.gmra.mrb[0].mxu1 %vm163_vm0, %v481_v45 }
 0x120   :  { %3957 = vmatpush3.msra.mxu1 %v665_v40  ;;  %v839_v48 = vpop.permute.xlu1 %838  ;;  %3328 = vmatmul.mubr.msk.f32.vlgmr.msra.gmra.mrb[0].mxu0 %vm163_vm0, %v480_v41  ;;  %v4044_v41 = vpack.c.bf16 %v1820_v37, %v1819_v35  ;;  %v1846_v35 = vld [vmem:[%s5672_s3 + $0xd8] sm:$0xff]  ;;  %v3366_v37 = vld [vmem:[%s5672_s3 + $0x150] sm:$0xff] }
 0x121   :  { %679 = vmatpush1.msra.mxu0 %v667_v47  ;;  %3961 = vmatprep.subr.mxu1 %v843_v46  ;;  %v1019_v51 = vpop.permute.xlu0 %1018  ;;  %v845_v55 = vsel %vm844_vm7, %v839_v48, %v841_v44  ;;  %v3359_v44 = vld [vmem:[%s5672_s3 + $0x118] sm:$0xff]  ;;  %v1821_v48 = vld [vmem:[%s5672_s3 + $0x10] sm:$0xff] }
 0x122   :  { %856 = vmatprep.subr.mxu0 %v846_v50  ;;  %570 = vmatprep.mubr.f32.mxu0 %v4478_v1  ;;  %v1838_v47 = vld [vmem:[%s5672_s3 + $0x98] sm:$0xff] }
 0x123   :  { %3958 = vmatprep.mubr.msk.f32.mxu1 %vm163_vm0, %v658_v49 }
 0x124   :  { %v1021_v52 = vpop.permute.xlu1 %1020  ;;  %3329 = vmatmul.mubr.msk.f32.gmra.mrb[2].mxu0 %vm163_vm0, %v481_v45  ;;  %v1837_v45 = vld [vmem:[%s5672_s3 + $0x90] sm:$0xff] }
 0x125   :  { %742 = vmatprep.mubr.f32.mxu0 %v4478_v1  ;;  %v1017_v54 = vpop.permute.xlu0 %1016  ;;  %v1024_v57 = vsel %vm1022_vm8, %v1019_v51, %v1021_v52  ;;  %v4046_v50 = vpack.c.bf16 %v1838_v47, %v1837_v45  ;;  %v1830_v45 = vld [vmem:[%s5672_s3 + $0x58] sm:$0xff] }
 0x126   :  { %v1023_v61 = vsel %vm1022_vm8, %v1017_v54, %v1019_v51  ;;  %v3360_v54 = vld [vmem:[%s5672_s3 + $0x120] sm:$0xff] }
 0x127   :  { %3959 = vmatmul.mubr.msk.f32.vlgmr.msra.gmra.mrb[0].mxu1 %vm163_vm0, %v659_v53 }
 0x128   :  { %3962 = vmatpush3.msra.mxu1 %v843_v46  ;;  %3332 = vmatmul.mubr.msk.f32.vlgmr.msra.gmra.mrb[0].mxu0 %vm163_vm0, %v658_v49  ;;  %v1197_v58 = vpop.permute.xlu1 %1196  ;;  %v4080_v46 = vpack.c.bf16 %v3359_v44, %v3358_v43  ;;  %v1822_v49 = vld [vmem:[%s5672_s3 + $0x18] sm:$0xff]  ;;  %v4062_v43 = vpack.c.bf16 %v1846_v35, %v1845_v34  ;;  %v1829_v44 = vld [vmem:[%s5672_s3 + $0x50] sm:$0xff] }
 0x129   :  { %857 = vmatpush1.msra.mxu0 %v845_v55  ;;  %3966 = vmatprep.subr.mxu1 %v1021_v52  ;;  %v1199_v59 = vpop.permute.xlu0 %1198  ;;  %v4048_v51 = vpack.c.bf16 %v1822_v49, %v1821_v48  ;;  %v3368_v48 = vld [vmem:[%s5672_s3 + $0x160] sm:$0xff]  ;;  %v3369_v49 = vld [vmem:[%s5672_s3 + $0x168] sm:$0xff] }
 0x12a   :  { %1034 = vmatprep.subr.mxu0 %v1024_v57  ;;  %748 = vmatprep.mubr.f32.mxu0 %v4478_v1  ;;  %v1202_v0 = vsel %vm1200_vm9, %v1197_v58, %v1199_v59  ;;  %v1839_v57 = vld [vmem:[%s5672_s3 + $0xa0] sm:$0xff] }
 0x12b   :  { %3963 = vmatprep.mubr.msk.f32.mxu1 %vm163_vm0, %v836_v56 }
 0x12c   :  { %3333 = vmatmul.mubr.msk.f32.gmra.mrb[2].mxu0 %vm163_vm0, %v659_v53  ;;  %v1195_v62 = vpop.permute.xlu1 %1194  ;;  %v3377_v53 = vld [vmem:[%s5672_s3 + $0x1a8] sm:$0xff] }
 0x12d   :  { %920 = vmatprep.mubr.f32.mxu0 %v4478_v1  ;;  %v1375_v2 = vpop.permute.xlu0 %1374  ;;  %v1201_v5 = vsel %vm1200_vm9, %v1195_v62, %v1197_v58  ;;  %v1840_v58 = vld [vmem:[%s5672_s3 + $0xa8] sm:$0xff] }
 0x12e   :  { %v1824_v62 = vld [vmem:[%s5672_s3 + $0x28] sm:$0xff] }
 0x12f   :  { %3964 = vmatmul.mubr.msk.f32.vlgmr.msra.gmra.mrb[0].mxu1 %vm163_vm0, %v837_v60 }
 0x130   :  { %3967 = vmatpush3.msra.mxu1 %v1021_v52  ;;  %3336 = vmatmul.mubr.msk.f32.vlgmr.msra.gmra.mrb[0].mxu0 %vm163_vm0, %v836_v56  ;;  %v1377_v4 = vpop.permute.xlu1 %1376  ;;  %v3376_v52 = vld [vmem:[%s5672_s3 + $0x1a0] sm:$0xff]  ;;  %v3361_v56 = vld [vmem:[%s5672_s3 + $0x128] sm:$0xff] }
 0x131   :  { %1035 = vmatpush1.msra.mxu0 %v1023_v61  ;;  %3971 = vmatprep.subr.mxu1 %v1199_v59  ;;  %v1373_v6 = vpop.permute.xlu0 %1372  ;;  %v1380_v8 = vsel %vm1378_vm10, %v1375_v2, %v1377_v4  ;;  %v4082_v55 = vpack.c.bf16 %v3377_v53, %v3376_v52  ;;  %v1823_v61 = vld [vmem:[%s5672_s3 + $0x20] sm:$0xff]  ;;  %v1848_v53 = vld [vmem:[%s5672_s3 + $0xe8] sm:$0xff] }
 0x132   :  { %1212 = vmatprep.subr.mxu0 %v1202_v0  ;;  %926 = vmatprep.mubr.f32.mxu0 %v4478_v1  ;;  %v1379_v12 = vsel %vm1378_vm10, %v1373_v6, %v1375_v2  ;;  %v3379_v0 = vld [vmem:[%s5672_s3 + $0x1b8] sm:$0xff]  ;;  %v3362_v2 = vld [vmem:[%s5672_s3 + $0x130] sm:$0xff]  ;;  %v1847_v52 = vld [vmem:[%s5672_s3 + $0xe0] sm:$0xff] }
 0x133   :  { %3968 = vmatprep.mubr.msk.f32.mxu1 %vm163_vm0, %v1014_v63  ;;  %v1841_v6 = vld [vmem:[%s5672_s3 + $0xb0] sm:$0xff] }
 0x134   :  { %3337 = vmatmul.mubr.msk.f32.gmra.mrb[2].mxu0 %vm163_vm0, %v837_v60  ;;  %v1553_v10 = vpop.permute.xlu1 %1552  ;;  %v4050_v60 = vpack.c.bf16 %v1840_v58, %v1839_v57  ;;  %v3386_v57 = vld [vmem:[%s5672_s3 + $0x1f0] sm:$0xff] }
 0x135   :  { %1098 = vmatprep.mubr.f32.mxu0 %v4478_v1  ;;  %v1555_v11 = vpop.permute.xlu0 %1554 }
 0x136   :  { %v1558_v14 = vsel %vm1556_vm11, %v1553_v10, %v1555_v11 }
 0x137   :  { %3969 = vmatmul.mubr.msk.f32.vlgmr.msra.gmra.mrb[0].mxu1 %vm163_vm0, %v1015_v3 }
 0x138   :  { %3972 = vmatpush3.msra.mxu1 %v1199_v59  ;;  %3340 = vmatmul.mubr.msk.f32.vlgmr.msra.gmra.mrb[0].mxu0 %vm163_vm0, %v1014_v63  ;;  %v1551_v16 = vpop.permute.xlu1 %1550  ;;  %v4084_v59 = vpack.c.bf16 %v3361_v56, %v3360_v54  ;;  %v3378_v63 = vld [vmem:[%s5672_s3 + $0x1b0] sm:$0xff]  ;;  %v4066_v54 = vpack.c.bf16 %v1848_v53, %v1847_v52  ;;  %v1832_v56 = vld [vmem:[%s5672_s3 + $0x68] sm:$0xff] }
 0x139   :  { %1213 = vmatpush1.msra.mxu0 %v1201_v5  ;;  %3976 = vmatprep.subr.mxu1 %v1377_v4  ;;  %v1557_v18 = vsel %vm1556_vm11, %v1551_v16, %v1553_v10  ;;  %v4086_v5 = vpack.c.bf16 %v3379_v0, %v3378_v63  ;;  %v1826_v10 = vld [vmem:[%s5672_s3 + $0x38] sm:$0xff]  ;;  %v3364_v16 = vld [vmem:[%s5672_s3 + $0x140] sm:$0xff]  ;;  %v1849_v0 = vld [vmem:[%s5672_s3 + $0xf0] sm:$0xff] }
 0x13a   :  { %1390 = vmatprep.subr.mxu0 %v1380_v8  ;;  %1104 = vmatprep.mubr.f32.mxu0 %v4478_v1  ;;  %v1825_v8 = vld [vmem:[%s5672_s3 + $0x30] sm:$0xff]  ;;  %v3449_v52 = vld [vmem:[%s5672_s3 + $0x3c8] sm:$0xff] }
 0x13b   :  { %3973 = vmatprep.mubr.msk.f32.mxu1 %vm163_vm0, %v1192_v7 }
 0x13c   :  { %3341 = vmatmul.mubr.msk.f32.gmra.mrb[2].mxu0 %vm163_vm0, %v1015_v3  ;;  %v3363_v3 = vld [vmem:[%s5672_s3 + $0x138] sm:$0xff] }
 0x13d   :  { %1276 = vmatprep.mubr.f32.mxu0 %v4478_v1 }
 0x13f   :  { %3974 = vmatmul.mubr.msk.f32.vlgmr.msra.gmra.mrb[0].mxu1 %vm163_vm0, %v1193_v9 }
 0x140   :  { %3977 = vmatpush3.msra.mxu1 %v1377_v4  ;;  %3344 = vmatmul.mubr.msk.f32.vlgmr.msra.gmra.mrb[0].mxu0 %vm163_vm0, %v1192_v7  ;;  %v4052_v4 = vpack.c.bf16 %v1824_v62, %v1823_v61  ;;  %v1842_v7 = vld [vmem:[%s5672_s3 + $0xb8] sm:$0xff] }
 0x141   :  { %1391 = vmatpush1.msra.mxu0 %v1379_v12  ;;  %3981 = vmatprep.subr.mxu1 %v1555_v11  ;;  %v3381_v12 = vld [vmem:[%s5672_s3 + $0x1c8] sm:$0xff]  ;;  %v3371_v61 = vld [vmem:[%s5672_s3 + $0x178] sm:$0xff] }
 0x142   :  { %1568 = vmatprep.subr.mxu0 %v1558_v14  ;;  %1282 = vmatprep.mubr.f32.mxu0 %v4478_v1  ;;  %v1843_v14 = vld [vmem:[%s5672_s3 + $0xc0] sm:$0xff] }
 0x143   :  { %3978 = vmatprep.mubr.msk.f32.mxu1 %vm163_vm0, %v1370_v13 }
 0x144   :  { %3345 = vmatmul.mubr.msk.f32.gmra.mrb[2].mxu0 %vm163_vm0, %v1193_v9  ;;  %v4054_v9 = vpack.c.bf16 %v1842_v7, %v1841_v6  ;;  %v3388_v6 = vld [vmem:[%s5672_s3 + $0x200] sm:$0xff] }
 0x145   :  { %1454 = vmatprep.mubr.f32.mxu0 %v4478_v1 }
 0x146   :  { %v1731_v20 = vpop.permute.xlu0 %1730 }
 0x147   :  { %3979 = vmatmul.mubr.msk.f32.vlgmr.msra.gmra.mrb[0].mxu1 %vm163_vm0, %v1371_v15 }
 0x148   :  { %3982 = vmatpush3.msra.mxu1 %v1555_v11  ;;  %3348 = vmatmul.mubr.msk.f32.vlgmr.msra.gmra.mrb[0].mxu0 %vm163_vm0, %v1370_v13  ;;  %v3380_v11 = vld [vmem:[%s5672_s3 + $0x1c0] sm:$0xff]  ;;  %v4088_v13 = vpack.c.bf16 %v3363_v3, %v3362_v2  ;;  %v1850_v2 = vld [vmem:[%s5672_s3 + $0xf8] sm:$0xff] }
 0x149   :  { %1569 = vmatpush1.msra.mxu0 %v1557_v18  ;;  %1460 = vmatprep.mubr.f32.mxu0 %v4478_v1  ;;  %v1844_v18 = vld [vmem:[%s5672_s3 + $0xc8] sm:$0xff]  ;;  %v4070_v3 = vpack.c.bf16 %v1850_v2, %v1849_v0 }
 0x14a   :  { %3983 = vmatprep.mubr.msk.f32.mxu1 %vm163_vm0, %v1548_v17  ;;  %4043 = vmatprep.subr.bf16.mxu1 %v4042_v36  ;;  %v3433_v2 = vld [vmem:[%s5672_s3 + $0x348] sm:$0xff] }
 0x14b   :  { %4079 = vmatprep.subr.bf16.mxu0 %v4078_v42  ;;  %v3385_v42 = vld [vmem:[%s5672_s3 + $0x1e8] sm:$0xff] }
 0x14c   :  { %3349 = vmatmul.mubr.msk.f32.gmra.mrb[2].mxu0 %vm163_vm0, %v1371_v15  ;;  %v4090_v15 = vpack.c.bf16 %v3381_v12, %v3380_v11 }
 0x14d   :  { %1632 = vmatprep.mubr.f32.mxu0 %v4478_v1 }
 0x14f   :  { %3984 = vmatmul.mubr.msk.f32.vlgmr.msra.gmra.mrb[0].mxu1 %vm163_vm0, %v1549_v19 }
 0x150   :  { %3352 = vmatmul.mubr.msk.f32.vlgmr.msra.gmra.mrb[0].mxu0 %vm163_vm0, %v1548_v17  ;;  %4045 = vmatpush3.bf16.msra.mxu1 %v4044_v41  ;;  %v3365_v17 = vld [vmem:[%s5672_s3 + $0x148] sm:$0xff]  ;;  %v3384_v41 = vld [vmem:[%s5672_s3 + $0x1e0] sm:$0xff] }
 0x151   :  { %1638 = vmatprep.mubr.f32.mxu0 %v4478_v1  ;;  %4081 = vmatpush3.bf16.msra.mxu0 %v4080_v46  ;;  %v4092_v33 = vpack.c.bf16 %v3365_v17, %v3364_v16  ;;  %v4096_v46 = vpack.c.bf16 %v3367_v38, %v3366_v37  ;;  %v4098_v47 = vpack.c.bf16 %v3385_v42, %v3384_v41  ;;  %v1736_v16 = vpop.permute.xlu0 %1735  ;;  %v3446_v17 = vld [vmem:[%s5672_s3 + $0x3b0] sm:$0xff]  ;;  %v1852_v41 = vld [vmem:[%s5672_s3 + $0x108] sm:$0x7] }
 0x152   :  { %4047 = vmatprep.subr.bf16.mxu1 %v4046_v50  ;;  %4083 = vmatprep.subr.bf16.mxu0 %v4082_v55  ;;  %v4064_v50 = vpack.c.bf16 %v1830_v45, %v1829_v44  ;;  %v1831_v55 = vld [vmem:[%s5672_s3 + $0x60] sm:$0xff]  ;;  %v3430_v45 = vld [vmem:[%s5672_s3 + $0x330] sm:$0xff] }
 0x153   :  { %v4068_v58 = vpack.c.bf16 %v1832_v56, %v1831_v55 }
 0x154   :  { %3353 = vmatmul.mubr.msk.f32.gmra.mrb[2].mxu0 %vm163_vm0, %v1549_v19  ;;  %4049 = vmatpush3.bf16.msra.mxu1 %v4048_v51  ;;  %v4056_v19 = vpack.c.bf16 %v1826_v10, %v1825_v8  ;;  %v4100_v51 = vpack.c.bf16 %v3369_v49, %v3368_v48  ;;  %v3389_v8 = vld [vmem:[%s5672_s3 + $0x208] sm:$0xff]  ;;  %vm4504_vm0 = vmmov 0  }
 0x155   :  { %4051 = vmatprep.subr.bf16.mxu1 %v4050_v60  ;;  %4085 = vmatpush3.bf16.msra.mxu0 %v4084_v59  ;;  %v3387_v59 = vld [vmem:[%s5672_s3 + $0x1f8] sm:$0xff]  ;;  %v3370_v60 = vld [vmem:[%s5672_s3 + $0x170] sm:$0xff]  ;;  %v3373_v10 = vld [vmem:[%s5672_s3 + $0x188] sm:$0xff]  ;;  %v4106_v12 = vpack.c.bf16 %v3389_v8, %v3388_v6 }
 0x156   :  { %4087 = vmatprep.subr.bf16.mxu0 %v4086_v5  ;;  %v4102_v62 = vpack.c.bf16 %v3387_v59, %v3386_v57  ;;  %v4104_v63 = vpack.c.bf16 %v3371_v61, %v3370_v60  ;;  %v1834_v5 = vld [vmem:[%s5672_s3 + $0x78] sm:$0xff]  ;;  %v3432_v59 = vld [vmem:[%s5672_s3 + $0x340] sm:$0xff]  ;;  %v3390_v60 = vld [vmem:[%s5672_s3 + $0x210] sm:$0xff] }
 0x157   :  { %v3391_v61 = vld [vmem:[%s5672_s3 + $0x218] sm:$0x7]  ;;  %v3450_v8 = vld [vmem:[%s5672_s3 + $0x3d0] sm:$0xff] }
 0x158   :  { %4053 = vmatpush3.bf16.msra.mxu1 %v4052_v4  ;;  %v1833_v4 = vld [vmem:[%s5672_s3 + $0x70] sm:$0xff] }
 0x159   :  { %4055 = vmatprep.subr.bf16.mxu1 %v4054_v9  ;;  %4089 = vmatpush3.bf16.msra.mxu0 %v4088_v13  ;;  %v4072_v7 = vpack.c.bf16 %v1834_v5, %v1833_v4  ;;  %v3372_v9 = vld [vmem:[%s5672_s3 + $0x180] sm:$0xff]  ;;  %v3411_v4 = vld [vmem:[%s5672_s3 + $0x2a8] sm:$0xff] }
 0x15a   :  { %4091 = vmatprep.subr.bf16.mxu0 %v4090_v15  ;;  %v4108_v13 = vpack.c.bf16 %v3373_v10, %v3372_v9  ;;  %v3451_v9 = vld [vmem:[%s5672_s3 + $0x3d8] sm:$0xff] }
 0x15c   :  { %4057 = vmatpush3.bf16.msra.mxu1 %v4056_v19  ;;  %v3447_v19 = vld [vmem:[%s5672_s3 + $0x3b8] sm:$0xff] }
 0x15d   :  { %4093 = vmatpush3.bf16.msra.mxu0 %v4092_v33 }
 0x222   :  { %v4685_v21 = vpop.f32.mrb[0].mxu1 }
 0x223   :  { %v1634_v22 = vpop.f32.mrb[0].mxu0  ;;  %v1711_v23 = vpop.f32.mrb[1].mxu1  ;;  %v1743_v33 = vadd.f32 %v4685_v21, %v1736_v16 }
 0x224   :  { %v4687_v24 = vadd.f32 %v1731_v20, %v1634_v22  ;;  %v1636_v25 = vpop.f32.mrb[1].mxu0  ;;  %v4697_v31 = vadd.f32 %v1731_v20, %v1711_v23  ;;  %v3383_v22 = vld [vmem:[%s5672_s3 + $0x1d8] sm:$0xff]  ;;  %v4058_v23 = vpack.c.bf16 %v1844_v18, %v1843_v14 }
 0x225   :  { %v4689_v26 = vadd.f32 %v1731_v20, %v1636_v25  ;;  %v3382_v20 = vld [vmem:[%s5672_s3 + $0x1d0] sm:$0xff]  ;;  %v1827_v25 = vld [vmem:[%s5672_s3 + $0x40] sm:$0xff]  ;;  %v1749_v21 = vmax.f32 %v1743_v33, 0.0  ;;  %v3413_v33 = vld [vmem:[%s5672_s3 + $0x2b8] sm:$0xff] }
 0x226   :  { %v1744_v27 = vmax.f32 %v4687_v24, 0.0  ;;  %v1746_v40 = vmax.f32 %v4697_v31, 0.0  ;;  %v4094_v36 = vpack.c.bf16 %v3383_v22, %v3382_v20  ;;  %4059 = vmatprep.subr.bf16.mxu1 %v4058_v23 }
 0x227   :  { %v1745_v28 = vmax.f32 %v4689_v26, 0.0  ;;  %v4693_v29 = vpop.f32.mrb[2].mxu0 }
 0x228   :  { %v4695_v30 = vpop.f32.mrb[3].mxu0  ;;  %4095 = vmatprep.subr.bf16.mxu0 %v4094_v36  ;;  %v4908_v20 = vadd.f32 %v1736_v16, %v4693_v29 }
 0x229   :  { %v4432_v32 = vpack.i.bf16 %v1744_v27, %v1745_v28  ;;  %4097 = vmatpush3.bf16.msra.mxu0 %v4096_v46  ;;  %v4911_v22 = vadd.f32 %v1736_v16, %v4695_v30  ;;  %v3431_v46 = vld [vmem:[%s5672_s3 + $0x338] sm:$0xff]  ;;  %v3434_v16 = vld [vmem:[%s5672_s3 + $0x350] sm:$0xff] }
 0x22a   :  { %4099 = vmatprep.subr.bf16.mxu0 %v4098_v47  ;;  %v1747_v30 = vmax.f32 %v4908_v20, 0.0  ;;  %v3394_v20 = vld [vmem:[%s5672_s3 + $0x220] sm:$0xff] }
 0x22b   :  { %4433 = vrot.lane.b32.xlu1 %v4432_v32, %s4493_s14  ;;  %v1828_v32 = vld [vmem:[%s5672_s3 + $0x48] sm:$0xff]  ;;  %v1748_v37 = vmax.f32 %v4911_v22, 0.0 }
 0x22c   :  { %v4060_v39 = vpack.c.bf16 %v1828_v32, %v1827_v25  ;;  %v4502_v25 = vmov 0.0|0.0   ;;  %v4150_v32 = vpack.c.bf16 %v3447_v19, %v3446_v17  ;;  %v3435_v17 = vld [vmem:[%s5672_s3 + $0x358] sm:$0xff]  ;;  %v3453_v19 = vld [vmem:[%s5672_s3 + $0x3e8] sm:$0xff] }
 0x22d   :  { %4101 = vmatpush3.bf16.msra.mxu0 %v4100_v51  ;;  %v4442_v31 = vpack.i.bf16 %v1747_v30, %v1748_v37  ;;  %v3448_v51 = vld [vmem:[%s5672_s3 + $0x3c0] sm:$0xff]  ;;  %v3395_v22 = vld [vmem:[%s5672_s3 + $0x228] sm:$0xff] }
 0x22e   :  { %4061 = vmatpush3.bf16.msra.mxu1 %v4060_v39  ;;  %4103 = vmatprep.subr.bf16.mxu0 %v4102_v62  ;;  %v1851_v39 = vld [vmem:[%s5672_s3 + $0x100] sm:$0xff]  ;;  %v4154_v0 = vpack.c.bf16 %v3449_v52, %v3448_v51  ;;  %v3416_v52 = vld [vmem:[%s5672_s3 + $0x2d0] sm:$0xff] }
 0x22f   :  { %1760 = vrot.lane.b32.xlu1 %v1746_v40, %s4493_s14  ;;  %4063 = vmatprep.subr.bf16.mxu1 %v4062_v43 }
 0x231   :  { %4105 = vmatpush3.bf16.msra.mxu0 %v4104_v63 }
 0x232   :  { %4065 = vmatpush3.bf16.msra.mxu1 %v4064_v50  ;;  %4107 = vmatprep.subr.bf16.mxu0 %v4106_v12  ;;  %v4075_v50 = vpack.c.bf16 %v1852_v41, %v1851_v39  ;;  %v3438_v41 = vld [vmem:[%s5672_s3 + $0x370] sm:$0xff] }
 0x233   :  { %4067 = vmatprep.subr.bf16.mxu1 %v4066_v54 }
 0x235   :  { %4109 = vmatpush3.bf16.msra.mxu0 %v4108_v13  ;;  %v4156_v13 = vpack.c.bf16 %v3433_v2, %v3432_v59  ;;  %v3458_v59 = vld [vmem:[%s5672_s3 + $0x410] sm:$0xff]  ;;  %v3418_v2 = vld [vmem:[%s5672_s3 + $0x2e0] sm:$0xff] }
 0x236   :  { %4069 = vmatpush3.bf16.msra.mxu1 %v4068_v58  ;;  %4151 = vmatprep.subr.bf16.mxu0 %v4150_v32  ;;  %v4152_v58 = vpack.c.bf16 %v3431_v46, %v3430_v45  ;;  %v3412_v32 = vld [vmem:[%s5672_s3 + $0x2b0] sm:$0xff]  ;;  %v3456_v45 = vld [vmem:[%s5672_s3 + $0x400] sm:$0xff]  ;;  %v3457_v46 = vld [vmem:[%s5672_s3 + $0x408] sm:$0xff] }
 0x237   :  { %4071 = vmatprep.subr.bf16.mxu1 %v4070_v3  ;;  %v3410_v3 = vld [vmem:[%s5672_s3 + $0x2a0] sm:$0xff] }
 0x23a   :  { %4073 = vmatpush3.bf16.msra.mxu1 %v4072_v7 }
 0x23b   :  { %4074 = vmatprep.subr.bf16.mxu1 %v4502_v25 }
 0x29d   :  { %v4434_v11 = vpop.permute.xlu1 %4433 }
 0x29e   :  { %v4436_v14 = vunpack.i.h.bf16 %v4434_v11  ;;  %v4435_v15 = vunpack.i.l.bf16 %v4434_v11  ;;  %v4111_v11 = vpack.c.bf16 %v3391_v61, %v3390_v60  ;;  %v3459_v60 = vld [vmem:[%s5672_s3 + $0x418] sm:$0xff] }
 0x2a0   :  { %v1768_v18 = vsel %vm157_vm4, %v4436_v14, %v4435_v15  ;;  %v4114_v14 = vpack.c.bf16 %v3411_v4, %v3410_v3  ;;  %v3419_v3 = vld [vmem:[%s5672_s3 + $0x2e8] sm:$0xff]  ;;  %v4174_v4 = vpack.c.bf16 %v3459_v60, %v3458_v59  ;;  %v3506_v59 = vld [vmem:[%s5672_s3 + $0x570] sm:$0xff]  ;;  %v3507_v60 = vld [vmem:[%s5672_s3 + $0x578] sm:$0xff] }
 0x2a1   :  { %v1761_v23 = vpop.permute.xlu1 %1760  ;;  %v1778_v29 = vmax.f32 %v1744_v27, %v1768_v18  ;;  %v3452_v18 = vld [vmem:[%s5672_s3 + $0x3e0] sm:$0xff] }
 0x2a2   :  { %v1769_v34 = vsel %vm157_vm4, %v4435_v15, %v1761_v23  ;;  %v1780_v35 = vmax.f32 %v1746_v40, %v1761_v23  ;;  %v4158_v15 = vpack.c.bf16 %v3451_v9, %v3450_v8  ;;  %v4160_v23 = vpack.c.bf16 %v3435_v17, %v3434_v16  ;;  %v3443_v8 = vld [vmem:[%s5672_s3 + $0x398] sm:$0xff]  ;;  %v3420_v17 = vld [vmem:[%s5672_s3 + $0x2f0] sm:$0xff] }
 0x2a3   :  { %v1779_v36 = vmax.f32 %v1745_v28, %v1769_v34  ;;  %v4162_v34 = vpack.c.bf16 %v3453_v19, %v3452_v18  ;;  %v3421_v18 = vld [vmem:[%s5672_s3 + $0x2f8] sm:$0xff] }
 0x2a4   :  { %1794 = vrot.lane.b32.xlu0 %v1780_v35, %s4495_s16 }
 0x2a5   :  { %v4437_v38 = vpack.i.bf16 %v1778_v29, %v1779_v36 }
 0x2a7   :  { %4438 = vrot.lane.b32.xlu1 %v4437_v38, %s4495_s16 }
 0x2a8   :  { %1766 = vrot.lane.b32.xlu0 %v1749_v21, %s4493_s14 }
 0x2ab   :  { %4443 = vrot.lane.b32.xlu1 %v4442_v31, %s4493_s14  ;;  %v3396_v31 = vld [vmem:[%s5672_s3 + $0x230] sm:$0xff] }
 0x316   :  { %v1795_v26 = vpop.permute.xlu0 %1794 }
 0x317   :  { %v4998_v10 = vmax.f32 %v1780_v35, %v1795_v26  ;;  %v3436_v35 = vld [vmem:[%s5672_s3 + $0x360] sm:$0xff] }
 0x319   :  { %v4439_v28 = vpop.permute.xlu1 %4438  ;;  %v2041_v38 = vrot.slane %v4998_v10, 2 }
 0x31a   :  { %v4441_v24 = vunpack.i.h.bf16 %v4439_v28  ;;  %v4440_v27 = vunpack.i.l.bf16 %v4439_v28  ;;  %v1767_v40 = vpop.permute.xlu0 %1766 }
 0x31b   :  { %v4934_v42 = vmax.f32 %v1749_v21, %v1767_v40  ;;  %v4118_v21 = vpack.c.bf16 %v3413_v33, %v3412_v32  ;;  %v3518_v32 = vld [vmem:[%s5672_s3 + $0x5d0] sm:$0xff]  ;;  %v3519_v33 = vld [vmem:[%s5672_s3 + $0x5d8] sm:$0xff] }
 0x31c   :  { %v1802_v43 = vsel %vm666_vm6, %v4441_v24, %v4440_v27  ;;  %v1803_v44 = vsel %vm666_vm6, %v4440_v27, %v1795_v26  ;;  %v3397_v26 = vld [vmem:[%s5672_s3 + $0x238] sm:$0xff]  ;;  %v3414_v27 = vld [vmem:[%s5672_s3 + $0x2c0] sm:$0xff] }
 0x31d   :  { %v4944_v47 = vmax.f32 %v1778_v29, %v1802_v43  ;;  %v4946_v48 = vmax.f32 %v1779_v36, %v1803_v44  ;;  %v4444_v49 = vpop.permute.xlu1 %4443  ;;  %1800 = vrot.lane.b32.xlu0 %v4934_v42, %s4495_s16  ;;  %v3437_v36 = vld [vmem:[%s5672_s3 + $0x368] sm:$0xff]  ;;  %v4116_v29 = vpack.c.bf16 %v3395_v22, %v3394_v20  ;;  %v3439_v43 = vld [vmem:[%s5672_s3 + $0x378] sm:$0xff]  ;;  %v4120_v44 = vpack.c.bf16 %v3397_v26, %v3396_v31  ;;  %v3444_v20 = vld [vmem:[%s5672_s3 + $0x3a0] sm:$0xff] }
 0x31e   :  { %v4446_v53 = vunpack.i.h.bf16 %v4444_v49  ;;  %v4445_v54 = vunpack.i.l.bf16 %v4444_v49  ;;  %v4164_v24 = vpack.c.bf16 %v3437_v36, %v3436_v35  ;;  %v3398_v49 = vld [vmem:[%s5672_s3 + $0x240] sm:$0xff]  ;;  %v4168_v51 = vpack.c.bf16 %v3439_v43, %v3438_v41  ;;  %v3445_v22 = vld [vmem:[%s5672_s3 + $0x3a8] sm:$0xff]  ;;  %v3404_v35 = vld [vmem:[%s5672_s3 + $0x270] sm:$0xff] }
 0x31f   :  { %1925 = vmatprep.mubr.f32.mxu1 %v4946_v48  ;;  %v2040_v56 = vrot.slane %v4946_v48, 2  ;;  %v2039_v57 = vrot.slane %v4944_v47, 2  ;;  %v2412_v5 = vrot.slane %v4946_v48, 6  ;;  %v2226_v28 = vrot.slane %v4946_v48, 4  ;;  %v3405_v36 = vld [vmem:[%s5672_s3 + $0x278] sm:$0xff]  ;;  %v3424_v41 = vld [vmem:[%s5672_s3 + $0x310] sm:$0xff] }
 0x320   :  { %v1770_v62 = vsel %vm157_vm4, %v4446_v53, %v4445_v54  ;;  %v1771_v63 = vsel %vm157_vm4, %v4445_v54, %v1767_v40  ;;  %1926 = vmatmul.mubr.f32.vlgmr.msra.gmra.mrb[2].mxu1 %v4944_v47  ;;  %v3415_v40 = vld [vmem:[%s5672_s3 + $0x2c8] sm:$0xff]  ;;  %v3417_v53 = vld [vmem:[%s5672_s3 + $0x2d8] sm:$0xff]  ;;  %v4170_v54 = vpack.c.bf16 %v3457_v46, %v3456_v45  ;;  %v4136_v26 = vpack.c.bf16 %v3405_v36, %v3404_v35 }
 0x321   :  { %4077 = vmatpush3.bf16.msk.msra.mxu1 %vm4957_vm14, %v4075_v50  ;;  %2113 = vmatprep.mubr.f32.mxu0 %v2040_v56  ;;  %v4988_v6 = vmax.f32 %v1747_v30, %v1770_v62  ;;  %v4990_v7 = vmax.f32 %v1748_v37, %v1771_v63  ;;  %v3454_v30 = vld [vmem:[%s5672_s3 + $0x3f0] sm:$0xff]  ;;  %v3455_v37 = vld [vmem:[%s5672_s3 + $0x3f8] sm:$0xff]  ;;  %v4122_v48 = vpack.c.bf16 %v3415_v40, %v3414_v27  ;;  %v3399_v50 = vld [vmem:[%s5672_s3 + $0x248] sm:$0xff]  ;;  %v2411_v45 = vrot.slane %v4944_v47, 6 }
 0x322   :  { %2114 = vmatmul.mubr.f32.vlgmr.msra.gmra.mrb[4].mxu0 %v2039_v57  ;;  %3990 = vmatprep.mubr.msk.f32.mxu1 %vm4504_vm0, %v4478_v1  ;;  %v4166_v39 = vpack.c.bf16 %v3455_v37, %v3454_v30  ;;  %v3440_v56 = vld [vmem:[%s5672_s3 + $0x380] sm:$0xff]  ;;  %v3441_v57 = vld [vmem:[%s5672_s3 + $0x388] sm:$0xff]  ;;  %v4126_v61 = vpack.c.bf16 %v3417_v53, %v3416_v52  ;;  %v3400_v62 = vld [vmem:[%s5672_s3 + $0x250] sm:$0xff] }
 0x323   :  { %4153 = vmatpush3.bf16.msra.mxu0 %v4152_v58  ;;  %2485 = vmatprep.mubr.f32.mxu0 %v2412_v5  ;;  %v4447_v12 = vpack.i.bf16 %v4988_v6, %v4990_v7  ;;  %v4124_v58 = vpack.c.bf16 %v3399_v50, %v3398_v49  ;;  %v3401_v63 = vld [vmem:[%s5672_s3 + $0x258] sm:$0xff]  ;;  %v3442_v5 = vld [vmem:[%s5672_s3 + $0x390] sm:$0xff]  ;;  %v3422_v30 = vld [vmem:[%s5672_s3 + $0x300] sm:$0xff] }
 0x324   :  { %3991 = vmatmul.mubr.msk.f32.vlgmr.msra.gmra.mrb[4].mxu1 %vm1853_vm15, %v4998_v10  ;;  %4155 = vmatprep.subr.bf16.mxu0 %v4154_v0  ;;  %v4172_v0 = vpack.c.bf16 %v3441_v57, %v3440_v56  ;;  %v4128_v9 = vpack.c.bf16 %v3401_v63, %v3400_v62  ;;  %v4176_v16 = vpack.c.bf16 %v3443_v8, %v3442_v5  ;;  %v3423_v37 = vld [vmem:[%s5672_s3 + $0x308] sm:$0xff]  ;;  %v3503_v31 = vld [vmem:[%s5672_s3 + $0x558] sm:$0xff]  ;;  %v3406_v40 = vld [vmem:[%s5672_s3 + $0x280] sm:$0xff] }
 0x325   :  { %4448 = vrot.lane.b32.xlu1 %v4447_v12, %s4495_s16  ;;  %4110 = vmatprep.subr.bf16.mxu1 %v4502_v25  ;;  %v3461_v12 = vld [vmem:[%s5672_s3 + $0x428] sm:$0xff]  ;;  %v4138_v27 = vpack.c.bf16 %v3423_v37, %v3422_v30  ;;  %v3425_v43 = vld [vmem:[%s5672_s3 + $0x318] sm:$0xff]  ;;  %v3524_v62 = vld [vmem:[%s5672_s3 + $0x600] sm:$0xff] }
 0x326   :  { %4113 = vmatpush3.bf16.msk.msra.mxu1 %vm4957_vm14, %v4111_v11  ;;  %3997 = vmatprep.mubr.msk.f32.mxu1 %vm4504_vm0, %v4478_v1  ;;  %v3460_v11 = vld [vmem:[%s5672_s3 + $0x420] sm:$0xff]  ;;  %v3505_v49 = vld [vmem:[%s5672_s3 + $0x568] sm:$0xff]  ;;  %v3523_v52 = vld [vmem:[%s5672_s3 + $0x5f8] sm:$0xff]  ;;  %v4142_v53 = vpack.c.bf16 %v3425_v43, %v3424_v41 }
 0x327   :  { %4157 = vmatpush3.bf16.msra.mxu0 %v4156_v13  ;;  %4115 = vmatprep.subr.bf16.mxu1 %v4114_v14  ;;  %v4130_v13 = vpack.c.bf16 %v3419_v3, %v3418_v2  ;;  %v3402_v14 = vld [vmem:[%s5672_s3 + $0x260] sm:$0xff]  ;;  %v4178_v19 = vpack.c.bf16 %v3461_v12, %v3460_v11  ;;  %v3409_v56 = vld [vmem:[%s5672_s3 + $0x298] sm:$0xff]  ;;  %v3525_v63 = vld [vmem:[%s5672_s3 + $0x608] sm:$0xff]  ;;  %v4232_v3 = vpack.c.bf16 %v3507_v60, %v3506_v59 }
 0x328   :  { %4159 = vmatprep.subr.bf16.mxu0 %v4158_v15  ;;  %v3403_v15 = vld [vmem:[%s5672_s3 + $0x268] sm:$0xff]  ;;  %v3508_v5 = vld [vmem:[%s5672_s3 + $0x580] sm:$0xff]  ;;  %v3526_v11 = vld [vmem:[%s5672_s3 + $0x610] sm:$0xff] }
 0x329   :  { %v3427_v2 = vld [vmem:[%s5672_s3 + $0x328] sm:$0x7]  ;;  %v3527_v12 = vld [vmem:[%s5672_s3 + $0x618] sm:$0xff]  ;;  %v3530_v37 = vld [vmem:[%s5672_s3 + $0x630] sm:$0xff] }
 0x32a   :  { %v3509_v8 = vld [vmem:[%s5672_s3 + $0x588] sm:$0xff]  ;;  %v3532_v43 = vld [vmem:[%s5672_s3 + $0x640] sm:$0xff] }
 0x32b   :  { %4161 = vmatpush3.bf16.msra.mxu0 %v4160_v23  ;;  %v4132_v23 = vpack.c.bf16 %v3403_v15, %v3402_v14  ;;  %v3462_v14 = vld [vmem:[%s5672_s3 + $0x430] sm:$0xff]  ;;  %v3463_v15 = vld [vmem:[%s5672_s3 + $0x438] sm:$0x7]  ;;  %v3513_v30 = vld [vmem:[%s5672_s3 + $0x5a8] sm:$0xff] }
 0x32c   :  { %3998 = vmatmul.mubr.msk.f32.vlgmr.msra.gmra.mrb[4].mxu1 %vm1853_vm15, %v2041_v38  ;;  %4163 = vmatprep.subr.bf16.mxu0 %v4162_v34  ;;  %v4134_v34 = vpack.c.bf16 %v3421_v18, %v3420_v17  ;;  %v4222_v38 = vpack.c.bf16 %v3519_v33, %v3518_v32  ;;  %v3483_v17 = vld [vmem:[%s5672_s3 + $0x4c8] sm:$0xff]  ;;  %v4238_v18 = vpack.c.bf16 %v3527_v12, %v3526_v11  ;;  %v2227_v33 = vrot.slane %v4998_v10, 4  ;;  %v3470_v60 = vld [vmem:[%s5672_s3 + $0x460] sm:$0xff] }
 0x32d   :  { %4117 = vmatpush3.bf16.msra.mxu1 %v4116_v29  ;;  %2299 = vmatprep.mubr.f32.mxu1 %v2226_v28  ;;  %v4180_v29 = vpack.c.bf16 %v3445_v22, %v3444_v20  ;;  %v3520_v28 = vld [vmem:[%s5672_s3 + $0x5e0] sm:$0xff]  ;;  %v3511_v20 = vld [vmem:[%s5672_s3 + $0x598] sm:$0xff]  ;;  %v4183_v22 = vpack.c.bf16 %v3463_v15, %v3462_v14  ;;  %v3529_v32 = vld [vmem:[%s5672_s3 + $0x628] sm:$0xff] }
 0x32e   :  { %4119 = vmatprep.subr.bf16.mxu1 %v4118_v21  ;;  %v3502_v21 = vld [vmem:[%s5672_s3 + $0x550] sm:$0xff]  ;;  %v3491_v11 = vld [vmem:[%s5672_s3 + $0x508] sm:$0xff]  ;;  %v3474_v14 = vld [vmem:[%s5672_s3 + $0x480] sm:$0xff] }
 0x32f   :  { %4165 = vmatpush3.bf16.msra.mxu0 %v4164_v24  ;;  %v3521_v24 = vld [vmem:[%s5672_s3 + $0x5e8] sm:$0xff] }
 0x330   :  { %4167 = vmatprep.subr.bf16.mxu0 %v4166_v39  ;;  %v3407_v39 = vld [vmem:[%s5672_s3 + $0x288] sm:$0xff]  ;;  %v4226_v46 = vpack.c.bf16 %v3521_v24, %v3520_v28  ;;  %v3485_v28 = vld [vmem:[%s5672_s3 + $0x4d8] sm:$0xff] }
 0x331   :  { %4121 = vmatpush3.bf16.msra.mxu1 %v4120_v44  ;;  %v4224_v44 = vpack.c.bf16 %v3503_v31, %v3502_v21  ;;  %v4140_v50 = vpack.c.bf16 %v3407_v39, %v3406_v40  ;;  %v3466_v21 = vld [vmem:[%s5672_s3 + $0x440] sm:$0xff]  ;;  %v3467_v31 = vld [vmem:[%s5672_s3 + $0x448] sm:$0xff]  ;;  %v3514_v40 = vld [vmem:[%s5672_s3 + $0x5b0] sm:$0xff] }
 0x332   :  { %4123 = vmatprep.subr.bf16.mxu1 %v4122_v48  ;;  %v3504_v48 = vld [vmem:[%s5672_s3 + $0x560] sm:$0xff]  ;;  %v3515_v39 = vld [vmem:[%s5672_s3 + $0x5b8] sm:$0xff]  ;;  %v4188_v41 = vpack.c.bf16 %v3467_v31, %v3466_v21  ;;  %v3475_v15 = vld [vmem:[%s5672_s3 + $0x488] sm:$0xff] }
 0x333   :  { %4169 = vmatpush3.bf16.msra.mxu0 %v4168_v51  ;;  %v3522_v51 = vld [vmem:[%s5672_s3 + $0x5f0] sm:$0xff]  ;;  %v4228_v57 = vpack.c.bf16 %v3505_v49, %v3504_v48  ;;  %v3469_v49 = vld [vmem:[%s5672_s3 + $0x458] sm:$0xff] }
 0x334   :  { %4171 = vmatprep.subr.bf16.mxu0 %v4170_v54  ;;  %v3408_v54 = vld [vmem:[%s5672_s3 + $0x290] sm:$0xff]  ;;  %v3481_v21 = vld [vmem:[%s5672_s3 + $0x4b8] sm:$0xff] }
 0x335   :  { %4125 = vmatpush3.bf16.msra.mxu1 %v4124_v58  ;;  %v4230_v58 = vpack.c.bf16 %v3523_v52, %v3522_v51  ;;  %v3468_v48 = vld [vmem:[%s5672_s3 + $0x450] sm:$0xff]  ;;  %v3487_v51 = vld [vmem:[%s5672_s3 + $0x4e8] sm:$0xff]  ;;  %v4248_v52 = vpack.c.bf16 %v3515_v39, %v3514_v40 }
 0x336   :  { %4127 = vmatprep.subr.bf16.mxu1 %v4126_v61  ;;  %v4144_v61 = vpack.c.bf16 %v3409_v56, %v3408_v54  ;;  %v3517_v54 = vld [vmem:[%s5672_s3 + $0x5c8] sm:$0xff]  ;;  %v4192_v56 = vpack.c.bf16 %v3469_v49, %v3468_v48 }
 0x337   :  { %4173 = vmatpush3.bf16.msra.mxu0 %v4172_v0  ;;  %v3426_v0 = vld [vmem:[%s5672_s3 + $0x320] sm:$0xff]  ;;  %v3499_v40 = vld [vmem:[%s5672_s3 + $0x548] sm:$0x7] }
 0x338   :  { %4175 = vmatprep.subr.bf16.mxu0 %v4174_v4  ;;  %v4234_v4 = vpack.c.bf16 %v3525_v63, %v3524_v62  ;;  %v3488_v62 = vld [vmem:[%s5672_s3 + $0x4f0] sm:$0xff]  ;;  %v3489_v63 = vld [vmem:[%s5672_s3 + $0x4f8] sm:$0xff] }
 0x339   :  { %4129 = vmatpush3.bf16.msra.mxu1 %v4128_v9  ;;  %v4147_v9 = vpack.c.bf16 %v3427_v2, %v3426_v0 }
 0x33a   :  { %4131 = vmatprep.subr.bf16.mxu1 %v4130_v13  ;;  %v2225_v13 = vrot.slane %v4944_v47, 4  ;;  %v4236_v47 = vpack.c.bf16 %v3509_v8, %v3508_v5  ;;  %v3472_v5 = vld [vmem:[%s5672_s3 + $0x470] sm:$0xff]  ;;  %v3473_v8 = vld [vmem:[%s5672_s3 + $0x478] sm:$0xff] }
 0x33b   :  { %4177 = vmatpush3.bf16.msra.mxu0 %v4176_v16  ;;  %v3482_v16 = vld [vmem:[%s5672_s3 + $0x4c0] sm:$0xff]  ;;  %v4200_v12 = vpack.c.bf16 %v3473_v8, %v3472_v5  ;;  %v3578_v5 = vld [vmem:[%s5672_s3 + $0x790] sm:$0xff] }
 0x33c   :  { %4179 = vmatprep.subr.bf16.mxu0 %v4178_v19  ;;  %v3510_v19 = vld [vmem:[%s5672_s3 + $0x590] sm:$0xff]  ;;  %v3596_v8 = vld [vmem:[%s5672_s3 + $0x820] sm:$0xff] }
 0x33d   :  { %4133 = vmatpush3.bf16.msra.mxu1 %v4132_v23  ;;  %v3528_v23 = vld [vmem:[%s5672_s3 + $0x620] sm:$0xff]  ;;  %v4240_v35 = vpack.c.bf16 %v3511_v20, %v3510_v19  ;;  %v3476_v19 = vld [vmem:[%s5672_s3 + $0x490] sm:$0xff]  ;;  %v3477_v20 = vld [vmem:[%s5672_s3 + $0x498] sm:$0xff] }
 0x33e   :  { %4135 = vmatprep.subr.bf16.mxu1 %v4134_v34  ;;  %v4186_v34 = vpack.c.bf16 %v3483_v17, %v3482_v16  ;;  %v4242_v36 = vpack.c.bf16 %v3529_v32, %v3528_v23  ;;  %v3492_v16 = vld [vmem:[%s5672_s3 + $0x510] sm:$0xff]  ;;  %v3493_v17 = vld [vmem:[%s5672_s3 + $0x518] sm:$0xff]  ;;  %v3495_v23 = vld [vmem:[%s5672_s3 + $0x528] sm:$0xff]  ;;  %v4208_v32 = vpack.c.bf16 %v3477_v20, %v3476_v19 }
 0x33f   :  { %4181 = vmatpush3.bf16.msra.mxu0 %v4180_v29  ;;  %v3512_v29 = vld [vmem:[%s5672_s3 + $0x5a0] sm:$0xff]  ;;  %v3598_v19 = vld [vmem:[%s5672_s3 + $0x830] sm:$0xff]  ;;  %v3599_v20 = vld [vmem:[%s5672_s3 + $0x838] sm:$0xff] }
 0x340   :  { %4223 = vmatprep.subr.bf16.mxu0 %v4222_v38  ;;  %v3531_v38 = vld [vmem:[%s5672_s3 + $0x638] sm:$0xff]  ;;  %v4244_v24 = vpack.c.bf16 %v3513_v30, %v3512_v29 }
 0x341   :  { %4137 = vmatpush3.bf16.msra.mxu1 %v4136_v26  ;;  %v3484_v26 = vld [vmem:[%s5672_s3 + $0x4d0] sm:$0xff]  ;;  %v3497_v29 = vld [vmem:[%s5672_s3 + $0x538] sm:$0xff] }
 0x342   :  { %2486 = vmatmul.mubr.f32.vlgmr.msra.gmra.mrb[6].mxu0 %v2411_v45  ;;  %4139 = vmatprep.subr.bf16.mxu1 %v4138_v27  ;;  %v4246_v27 = vpack.c.bf16 %v3531_v38, %v3530_v37  ;;  %v2413_v45 = vrot.slane %v4998_v10, 6  ;;  %v3480_v38 = vld [vmem:[%s5672_s3 + $0x4b0] sm:$0xff] }
 0x343   :  { %4225 = vmatpush3.bf16.msra.mxu0 %v4224_v44  ;;  %v3533_v44 = vld [vmem:[%s5672_s3 + $0x648] sm:$0xff]  ;;  %v4216_v31 = vpack.c.bf16 %v3481_v21, %v3480_v38  ;;  %v3583_v38 = vld [vmem:[%s5672_s3 + $0x7b8] sm:$0xff] }
 0x344   :  { %4227 = vmatprep.subr.bf16.mxu0 %v4226_v46  ;;  %v4190_v46 = vpack.c.bf16 %v3485_v28, %v3484_v26  ;;  %v4250_v10 = vpack.c.bf16 %v3533_v44, %v3532_v43  ;;  %v3574_v44 = vld [vmem:[%s5672_s3 + $0x770] sm:$0xff] }
 0x345   :  { %4141 = vmatpush3.bf16.msra.mxu1 %v4140_v50  ;;  %v3486_v50 = vld [vmem:[%s5672_s3 + $0x4e0] sm:$0xff] }
 0x346   :  { %4143 = vmatprep.subr.bf16.mxu1 %v4142_v53  ;;  %v3516_v53 = vld [vmem:[%s5672_s3 + $0x5c0] sm:$0xff]  ;;  %v4194_v59 = vpack.c.bf16 %v3487_v51, %v3486_v50  ;;  %v3534_v51 = vld [vmem:[%s5672_s3 + $0x650] sm:$0xff] }
 0x347   :  { %4229 = vmatpush3.bf16.msra.mxu0 %v4228_v57  ;;  %v3590_v57 = vld [vmem:[%s5672_s3 + $0x7f0] sm:$0xff]  ;;  %v4252_v0 = vpack.c.bf16 %v3517_v54, %v3516_v53  ;;  %v3592_v50 = vld [vmem:[%s5672_s3 + $0x800] sm:$0xff] }
 0x348   :  { %4231 = vmatprep.subr.bf16.mxu0 %v4230_v58  ;;  %v3591_v58 = vld [vmem:[%s5672_s3 + $0x7f8] sm:$0xff]  ;;  %v3554_v54 = vld [vmem:[%s5672_s3 + $0x6e0] sm:$0xff] }
 0x349   :  { %4145 = vmatpush3.bf16.msra.mxu1 %v4144_v61  ;;  %v3471_v61 = vld [vmem:[%s5672_s3 + $0x468] sm:$0xff]  ;;  %v4294_v2 = vpack.c.bf16 %v3591_v58, %v3590_v57  ;;  %v3576_v57 = vld [vmem:[%s5672_s3 + $0x780] sm:$0xff] }
 0x34a   :  { %4146 = vmatprep.subr.bf16.mxu1 %v4502_v25  ;;  %v3577_v58 = vld [vmem:[%s5672_s3 + $0x788] sm:$0xff] }
 0x34b   :  { %4233 = vmatpush3.bf16.msra.mxu0 %v4232_v3  ;;  %v4196_v3 = vpack.c.bf16 %v3471_v61, %v3470_v60 }
 0x34c   :  { %2300 = vmatmul.mubr.f32.vlgmr.msra.gmra.mrb[6].mxu1 %v2225_v13  ;;  %4235 = vmatprep.subr.bf16.mxu0 %v4234_v4  ;;  %v4198_v4 = vpack.c.bf16 %v3489_v63, %v3488_v62  ;;  %v3594_v62 = vld [vmem:[%s5672_s3 + $0x810] sm:$0xff]  ;;  %v3595_v63 = vld [vmem:[%s5672_s3 + $0x818] sm:$0xff] }
 0x34d   :  { %4149 = vmatpush3.bf16.msk.msra.mxu1 %vm4957_vm14, %v4147_v9  ;;  %4004 = vmatprep.mubr.msk.f32.mxu1 %vm4504_vm0, %v4478_v1  ;;  %v3490_v9 = vld [vmem:[%s5672_s3 + $0x500] sm:$0xff] }
 0x34e   :  { %4182 = vmatprep.subr.bf16.mxu1 %v4502_v25  ;;  %v4202_v13 = vpack.c.bf16 %v3491_v11, %v3490_v9  ;;  %v3597_v9 = vld [vmem:[%s5672_s3 + $0x828] sm:$0xff]  ;;  %v3538_v11 = vld [vmem:[%s5672_s3 + $0x660] sm:$0xff] }
 0x34f   :  { %4237 = vmatpush3.bf16.msra.mxu0 %v4236_v47  ;;  %v4204_v47 = vpack.c.bf16 %v3475_v15, %v3474_v14  ;;  %v3556_v14 = vld [vmem:[%s5672_s3 + $0x6f0] sm:$0xff]  ;;  %v3557_v15 = vld [vmem:[%s5672_s3 + $0x6f8] sm:$0xff] }
 0x350   :  { %4005 = vmatmul.mubr.msk.f32.vlgmr.msra.gmra.mrb[4].mxu1 %vm1853_vm15, %v2227_v33  ;;  %4239 = vmatprep.subr.bf16.mxu0 %v4238_v18  ;;  %v4206_v18 = vpack.c.bf16 %v3493_v17, %v3492_v16  ;;  %v4306_v16 = vpack.c.bf16 %v3597_v9, %v3596_v8  ;;  %v3580_v17 = vld [vmem:[%s5672_s3 + $0x7a0] sm:$0xff]  ;;  %v3589_v8 = vld [vmem:[%s5672_s3 + $0x7e8] sm:$0xff] }
 0x351   :  { %4185 = vmatpush3.bf16.msk.msra.mxu1 %vm4957_vm14, %v4183_v22  ;;  %4011 = vmatprep.mubr.msk.f32.mxu1 %vm4504_vm0, %v4478_v1  ;;  %v3494_v22 = vld [vmem:[%s5672_s3 + $0x520] sm:$0xff] }
 0x352   :  { %4187 = vmatprep.subr.bf16.mxu1 %v4186_v34  ;;  %v4210_v33 = vpack.c.bf16 %v3495_v23, %v3494_v22  ;;  %v3478_v34 = vld [vmem:[%s5672_s3 + $0x4a0] sm:$0xff]  ;;  %v4262_v23 = vpack.c.bf16 %v3557_v15, %v3556_v14 }
 0x353   :  { %4241 = vmatpush3.bf16.msra.mxu0 %v4240_v35  ;;  %v3479_v35 = vld [vmem:[%s5672_s3 + $0x4a8] sm:$0xff]  ;;  %v3566_v15 = vld [vmem:[%s5672_s3 + $0x740] sm:$0xff] }
 0x354   :  { %4243 = vmatprep.subr.bf16.mxu0 %v4242_v36  ;;  %v3496_v36 = vld [vmem:[%s5672_s3 + $0x530] sm:$0xff]  ;;  %v4212_v30 = vpack.c.bf16 %v3479_v35, %v3478_v34 }
 0x355   :  { %v4214_v37 = vpack.c.bf16 %v3497_v29, %v3496_v36  ;;  %v3558_v36 = vld [vmem:[%s5672_s3 + $0x700] sm:$0xff]  ;;  %v3559_v29 = vld [vmem:[%s5672_s3 + $0x708] sm:$0xff] }
 0x357   :  { %4245 = vmatpush3.bf16.msra.mxu0 %v4244_v24 }
 0x358   :  { %4012 = vmatmul.mubr.msk.f32.vlgmr.msra.gmra.mrb[4].mxu1 %vm1853_vm15, %v2413_v45  ;;  %4247 = vmatprep.subr.bf16.mxu0 %v4246_v27  ;;  %v3498_v27 = vld [vmem:[%s5672_s3 + $0x540] sm:$0xff]  ;;  %v3575_v45 = vld [vmem:[%s5672_s3 + $0x778] sm:$0xff] }
 0x359   :  { %4189 = vmatpush3.bf16.msra.mxu1 %v4188_v41  ;;  %v4219_v49 = vpack.c.bf16 %v3499_v40, %v3498_v27  ;;  %v4296_v53 = vpack.c.bf16 %v3575_v45, %v3574_v44  ;;  %v3543_v27 = vld [vmem:[%s5672_s3 + $0x688] sm:$0xff]  ;;  %v3584_v44 = vld [vmem:[%s5672_s3 + $0x7c0] sm:$0xff] }
 0x35a   :  { %4191 = vmatprep.subr.bf16.mxu1 %v4190_v46  ;;  %v3585_v45 = vld [vmem:[%s5672_s3 + $0x7c8] sm:$0xff] }
 0x35b   :  { %4249 = vmatpush3.bf16.msra.mxu0 %v4248_v52  ;;  %v3535_v52 = vld [vmem:[%s5672_s3 + $0x658] sm:$0x7] }
 0x35c   :  { %4251 = vmatprep.subr.bf16.mxu0 %v4250_v10  ;;  %v4255_v60 = vpack.c.bf16 %v3535_v52, %v3534_v51  ;;  %v3544_v52 = vld [vmem:[%s5672_s3 + $0x690] sm:$0xff] }
 0x35d   :  { %4193 = vmatpush3.bf16.msra.mxu1 %v4192_v56  ;;  %v3555_v56 = vld [vmem:[%s5672_s3 + $0x6e8] sm:$0xff] }
 0x35e   :  { %4195 = vmatprep.subr.bf16.mxu1 %v4194_v59 }
 0x35f   :  { %4253 = vmatpush3.bf16.msra.mxu0 %v4252_v0 }
 0x360   :  { %4295 = vmatprep.subr.bf16.mxu0 %v4294_v2  ;;  %v4258_v2 = vpack.c.bf16 %v3555_v56, %v3554_v54  ;;  %v3586_v56 = vld [vmem:[%s5672_s3 + $0x7d0] sm:$0xff] }
 0x361   :  { %4197 = vmatpush3.bf16.msra.mxu1 %v4196_v3  ;;  %v4300_v3 = vpack.c.bf16 %v3577_v58, %v3576_v57  ;;  %v3587_v57 = vld [vmem:[%s5672_s3 + $0x7d8] sm:$0xff] }
 0x362   :  { %4199 = vmatprep.subr.bf16.mxu1 %v4198_v4  ;;  %v4302_v4 = vpack.c.bf16 %v3595_v63, %v3594_v62  ;;  %v3546_v62 = vld [vmem:[%s5672_s3 + $0x6a0] sm:$0xff]  ;;  %v3547_v63 = vld [vmem:[%s5672_s3 + $0x6a8] sm:$0xff] }
 0x363   :  { %v4276_v9 = vpack.c.bf16 %v3547_v63, %v3546_v62 }
 0x365   :  { %4201 = vmatpush3.bf16.msra.mxu1 %v4200_v12  ;;  %v3539_v12 = vld [vmem:[%s5672_s3 + $0x668] sm:$0xff] }
 0x366   :  { %4203 = vmatprep.subr.bf16.mxu1 %v4202_v13 }
 0x369   :  { %4205 = vmatpush3.bf16.msra.mxu1 %v4204_v47  ;;  %v3581_v47 = vld [vmem:[%s5672_s3 + $0x7a8] sm:$0xff] }
 0x36a   :  { %4207 = vmatprep.subr.bf16.mxu1 %v4206_v18  ;;  %v4260_v18 = vpack.c.bf16 %v3539_v12, %v3538_v11  ;;  %v4308_v35 = vpack.c.bf16 %v3581_v47, %v3580_v17  ;;  %v3548_v12 = vld [vmem:[%s5672_s3 + $0x6b0] sm:$0xff] }
 0x36d   :  { %4209 = vmatpush3.bf16.msra.mxu1 %v4208_v32  ;;  %v3540_v32 = vld [vmem:[%s5672_s3 + $0x670] sm:$0xff] }
 0x36e   :  { %4211 = vmatprep.subr.bf16.mxu1 %v4210_v33  ;;  %v3541_v33 = vld [vmem:[%s5672_s3 + $0x678] sm:$0xff] }
 0x36f   :  { %v4264_v21 = vpack.c.bf16 %v3541_v33, %v3540_v32 }
 0x371   :  { %4213 = vmatpush3.bf16.msra.mxu1 %v4212_v30  ;;  %v4310_v30 = vpack.c.bf16 %v3599_v20, %v3598_v19  ;;  %v3551_v19 = vld [vmem:[%s5672_s3 + $0x6c8] sm:$0xff]  ;;  %v3568_v20 = vld [vmem:[%s5672_s3 + $0x750] sm:$0xff] }
 0x372   :  { %4215 = vmatprep.subr.bf16.mxu1 %v4214_v37  ;;  %v3582_v37 = vld [vmem:[%s5672_s3 + $0x7b0] sm:$0xff] }
 0x373   :  { %v4312_v40 = vpack.c.bf16 %v3583_v38, %v3582_v37 }
 0x375   :  { %4217 = vmatpush3.bf16.msra.mxu1 %v4216_v31  ;;  %v3600_v31 = vld [vmem:[%s5672_s3 + $0x840] sm:$0xff] }
 0x376   :  { %4218 = vmatprep.subr.bf16.mxu1 %v4502_v25 }
 0x38f   :  { %v1801_v39 = vpop.permute.xlu0 %1800 }
 0x390   :  { %v5456_v0 = vmax.f32 %v4934_v42, %v1801_v39  ;;  %v3579_v42 = vld [vmem:[%s5672_s3 + $0x798] sm:$0xff] }
 0x391   :  { %v4304_v13 = vpack.c.bf16 %v3579_v42, %v3578_v5  ;;  %v3588_v42 = vld [vmem:[%s5672_s3 + $0x7e0] sm:$0xff] }
 0x392   :  { %v2783_v22 = vrot.slane %v5456_v0, 2  ;;  %v4324_v14 = vpack.c.bf16 %v3589_v8, %v3588_v42 }
 0x397   :  { %v4449_v26 = vpop.permute.xlu1 %4448 }
 0x398   :  { %v4451_v28 = vunpack.i.h.bf16 %v4449_v26  ;;  %v4450_v24 = vunpack.i.l.bf16 %v4449_v26  ;;  %v3601_v26 = vld [vmem:[%s5672_s3 + $0x848] sm:$0xff] }
 0x39a   :  { %v1804_v41 = vsel %vm666_vm6, %v4451_v28, %v4450_v24  ;;  %v1805_v43 = vsel %vm666_vm6, %v4450_v24, %v1801_v39  ;;  %v4266_v28 = vpack.c.bf16 %v3559_v29, %v3558_v36  ;;  %v3542_v24 = vld [vmem:[%s5672_s3 + $0x680] sm:$0xff]  ;;  %v3560_v39 = vld [vmem:[%s5672_s3 + $0x710] sm:$0xff] }
 0x39b   :  { %v5413_v46 = vmax.f32 %v4988_v6, %v1804_v41  ;;  %v5416_v48 = vmax.f32 %v4990_v7, %v1805_v43  ;;  %v3593_v6 = vld [vmem:[%s5672_s3 + $0x808] sm:$0xff]  ;;  %v3561_v41 = vld [vmem:[%s5672_s3 + $0x718] sm:$0xff]  ;;  %v4314_v43 = vpack.c.bf16 %v3601_v26, %v3600_v31  ;;  %v3570_v29 = vld [vmem:[%s5672_s3 + $0x760] sm:$0xff] }
 0x39c   :  { %v4298_v61 = vpack.c.bf16 %v3593_v6, %v3592_v50  ;;  %v3603_v50 = vld [vmem:[%s5672_s3 + $0x858] sm:$0xff]  ;;  %v4270_v51 = vpack.c.bf16 %v3561_v41, %v3560_v39 }
 0x39d   :  { %2667 = vmatprep.mubr.f32.mxu1 %v5416_v48  ;;  %v2782_v7 = vrot.slane %v5416_v48, 2  ;;  %v2781_v10 = vrot.slane %v5413_v46, 2  ;;  %v3154_v59 = vrot.slane %v5416_v48, 6  ;;  %v2968_v34 = vrot.slane %v5416_v48, 4  ;;  %v3545_v6 = vld [vmem:[%s5672_s3 + $0x698] sm:$0xff] }
 0x39e   :  { %2668 = vmatmul.mubr.f32.vlgmr.msra.gmra.mrb[8].mxu1 %v5413_v46  ;;  %v4268_v48 = vpack.c.bf16 %v3543_v27, %v3542_v24  ;;  %v4272_v58 = vpack.c.bf16 %v3545_v6, %v3544_v52  ;;  %v2967_v38 = vrot.slane %v5413_v46, 4  ;;  %v3607_v31 = vld [vmem:[%s5672_s3 + $0x878] sm:$0x7]  ;;  %v1818_v27 = vld [vmem:[%s5673_s4] sm:$0x3]  ;;  %s4505_s4 = smov [#allocation3]  }
 0x39f   :  { %4221 = vmatpush3.bf16.msk.msra.mxu1 %vm4957_vm14, %v4219_v49  ;;  %2855 = vmatprep.mubr.f32.mxu0 %v2782_v7  ;;  %v3602_v49 = vld [vmem:[%s5672_s3 + $0x850] sm:$0xff]  ;;  %v4316_v7 = vpack.c.bf16 %v3585_v45, %v3584_v44  ;;  %s3312_s30 = sshll.u32 %s4505_s4, 4  ;;  %s3313_s30 = int_to_ptr.vmem [resolvable:$true] %s3312_s30 }
 0x3a0   :  { %2856 = vmatmul.mubr.f32.vlgmr.msra.gmra.mrb[8].mxu0 %v2781_v10  ;;  %4018 = vmatprep.mubr.msk.f32.mxu1 %vm4504_vm0, %v4478_v1  ;;  %v3562_v10 = vld [vmem:[%s5672_s3 + $0x720] sm:$0xff]  ;;  %v4318_v54 = vpack.c.bf16 %v3603_v50, %v3602_v49  ;;  %s4452_s0 = scalar_lea.vmem %s3313_s30, 32  ;;  %p4457_p1 = scmp.lt.s32.totalorder %s3313_s30, %s3313_s30 }
 0x3a1   :  { %4297 = vmatpush3.bf16.msra.mxu0 %v4296_v53  ;;  %3227 = vmatprep.mubr.f32.mxu0 %v3154_v59  ;;  %v3563_v53 = vld [vmem:[%s5672_s3 + $0x728] sm:$0xff]  ;;  %v3604_v59 = vld [vmem:[%s5672_s3 + $0x860] sm:$0xff]  ;;  %p4453_p0 = scmp.ne.s32.totalorder %s3313_s30, %s4452_s0  ;;  %p4458_p2 = scmp.lt.s32.totalorder %s4452_s0, %s4452_s0 }
 0x3a2   :  { %4019 = vmatmul.mubr.msk.f32.vlgmr.msra.gmra.mrb[4].mxu1 %vm1853_vm15, %v5456_v0  ;;  %4254 = vmatprep.subr.bf16.mxu1 %v4502_v25 }
 0x3a3   :  { %4257 = vmatpush3.bf16.msk.msra.mxu1 %vm4957_vm14, %v4255_v60  ;;  %4299 = vmatprep.subr.bf16.mxu0 %v4298_v61  ;;  %v3605_v60 = vld [vmem:[%s5672_s3 + $0x868] sm:$0xff]  ;;  %v4274_v61 = vpack.c.bf16 %v3563_v53, %v3562_v10  ;;  %p4459_p3 = por %p4458_p2, %p4457_p1 }
 0x3a4   :  { %4025 = vmatprep.mubr.msk.f32.mxu1 %vm4504_vm0, %v4478_v1  ;;  %4259 = vmatprep.subr.bf16.mxu1 %v4258_v2  ;;  %v4320_v2 = vpack.c.bf16 %v3587_v57, %v3586_v56  ;;  %v4322_v5 = vpack.c.bf16 %v3605_v60, %v3604_v59 }
 0x3a5   :  { %4301 = vmatpush3.bf16.msra.mxu0 %v4300_v3  ;;  %v3564_v3 = vld [vmem:[%s5672_s3 + $0x730] sm:$0xff]  ;;  %p4460_p4 = pnand %p4459_p3, %p4453_p0 }
 0x3a6   :  { %4303 = vmatprep.subr.bf16.mxu0 %v4302_v4  ;;  %v3565_v4 = vld [vmem:[%s5672_s3 + $0x738] sm:$0xff] }
 0x3a7   :  { %v4278_v11 = vpack.c.bf16 %v3565_v4, %v3564_v3 }
 0x3a9   :  { %4305 = vmatpush3.bf16.msra.mxu0 %v4304_v13  ;;  %v3549_v13 = vld [vmem:[%s5672_s3 + $0x6b8] sm:$0xff] }
 0x3aa   :  { %4026 = vmatmul.mubr.msk.f32.vlgmr.msra.gmra.mrb[4].mxu1 %vm1853_vm15, %v2783_v22  ;;  %4307 = vmatprep.subr.bf16.mxu0 %v4306_v16  ;;  %v3567_v16 = vld [vmem:[%s5672_s3 + $0x748] sm:$0xff]  ;;  %v4280_v17 = vpack.c.bf16 %v3549_v13, %v3548_v12  ;;  %v3569_v22 = vld [vmem:[%s5672_s3 + $0x758] sm:$0xff] }
 0x3ab   :  { %4261 = vmatpush3.bf16.msra.mxu1 %v4260_v18  ;;  %3041 = vmatprep.mubr.f32.mxu1 %v2968_v34  ;;  %v4282_v47 = vpack.c.bf16 %v3567_v16, %v3566_v15  ;;  %v3550_v18 = vld [vmem:[%s5672_s3 + $0x6c0] sm:$0xff]  ;;  %v4286_v33 = vpack.c.bf16 %v3569_v22, %v3568_v20  ;;  %v3552_v34 = vld [vmem:[%s5672_s3 + $0x6d0] sm:$0xff] }
 0x3ac   :  { %4263 = vmatprep.subr.bf16.mxu1 %v4262_v23  ;;  %v3153_v23 = vrot.slane %v5413_v46, 6  ;;  %v4284_v32 = vpack.c.bf16 %v3551_v19, %v3550_v18  ;;  %v2969_v46 = vrot.slane %v5456_v0, 4 }
 0x3ad   :  { %4309 = vmatpush3.bf16.msra.mxu0 %v4308_v35  ;;  %v3553_v35 = vld [vmem:[%s5672_s3 + $0x6d8] sm:$0xff] }
 0x3ae   :  { %4311 = vmatprep.subr.bf16.mxu0 %v4310_v30  ;;  %v4288_v36 = vpack.c.bf16 %v3553_v35, %v3552_v34  ;;  %v3571_v30 = vld [vmem:[%s5672_s3 + $0x768] sm:$0x7] }
 0x3af   :  { %4265 = vmatpush3.bf16.msra.mxu1 %v4264_v21  ;;  %v4291_v37 = vpack.c.bf16 %v3571_v30, %v3570_v29  ;;  %v3606_v21 = vld [vmem:[%s5672_s3 + $0x870] sm:$0xff] }
 0x3b0   :  { %4267 = vmatprep.subr.bf16.mxu1 %v4266_v28  ;;  %v4327_v26 = vpack.c.bf16 %v3607_v31, %v3606_v21  ;;  %v3155_v28 = vrot.slane %v5456_v0, 6 }
 0x3b1   :  { %4313 = vmatpush3.bf16.msra.mxu0 %v4312_v40 }
 0x3b2   :  { %4315 = vmatprep.subr.bf16.mxu0 %v4314_v43 }
 0x3b3   :  { %4269 = vmatpush3.bf16.msra.mxu1 %v4268_v48 }
 0x3b4   :  { %4271 = vmatprep.subr.bf16.mxu1 %v4270_v51 }
 0x3b5   :  { %4317 = vmatpush3.bf16.msra.mxu0 %v4316_v7 }
 0x3b6   :  { %4319 = vmatprep.subr.bf16.mxu0 %v4318_v54 }
 0x3b7   :  { %4273 = vmatpush3.bf16.msra.mxu1 %v4272_v58 }
 0x3b8   :  { %4275 = vmatprep.subr.bf16.mxu1 %v4274_v61 }
 0x3b9   :  { %4321 = vmatpush3.bf16.msra.mxu0 %v4320_v2 }
 0x3ba   :  { %4323 = vmatprep.subr.bf16.mxu0 %v4322_v5 }
 0x3bb   :  { %4277 = vmatpush3.bf16.msra.mxu1 %v4276_v9 }
 0x3bc   :  { %4279 = vmatprep.subr.bf16.mxu1 %v4278_v11 }
 0x3bd   :  { %4325 = vmatpush3.bf16.msra.mxu0 %v4324_v14 }
 0x3bf   :  { %4281 = vmatpush3.bf16.msra.mxu1 %v4280_v17 }
 0x3c0   :  { %3228 = vmatmul.mubr.f32.vlgmr.msra.gmra.mrb[10].mxu0 %v3153_v23  ;;  %4283 = vmatprep.subr.bf16.mxu1 %v4282_v47 }
 0x3c3   :  { %4285 = vmatpush3.bf16.msra.mxu1 %v4284_v32 }
 0x3c4   :  { %4287 = vmatprep.subr.bf16.mxu1 %v4286_v33 }
 0x3c7   :  { %4289 = vmatpush3.bf16.msra.mxu1 %v4288_v36 }
 0x3c8   :  { %4290 = vmatprep.subr.bf16.mxu1 %v4502_v25 }
 0x3ca   :  { %3042 = vmatmul.mubr.f32.vlgmr.msra.gmra.mrb[10].mxu1 %v2967_v38 }
 0x3cb   :  { %4293 = vmatpush3.bf16.msk.msra.mxu1 %vm4957_vm14, %v4291_v37  ;;  %4032 = vmatprep.mubr.msk.f32.mxu1 %vm4504_vm0, %v4478_v1 }
 0x3cc   :  { %4326 = vmatprep.subr.bf16.mxu1 %v4502_v25 }
 0x3ce   :  { %4033 = vmatmul.mubr.msk.f32.vlgmr.msra.gmra.mrb[4].mxu1 %vm1853_vm15, %v2969_v46 }
 0x3cf   :  { %4329 = vmatpush3.bf16.msk.msra.mxu1 %vm4957_vm14, %v4327_v26  ;;  %4039 = vmatprep.mubr.msk.f32.mxu1 %vm4504_vm0, %v4478_v1 }
 0x3d6   :  { %4040 = vmatmul.mubr.msk.f32.vlgmr.msra.gmra.mrb[4].mxu1 %vm1853_vm15, %v3155_v28 }
 0x3f3   :  { %v3669_v24 = vpop.f32.mrb[2].mxu1 }
 0x3f4   :  { %v3670_v40 = vpop.f32.mrb[3].mxu1 }
 0x3f5   :  { %v3671_v39 = vadd.f32 %v3670_v40, %v3669_v24  ;;  %v3707_v25 = vpop.f32.mrb[4].mxu0 }
 0x3f6   :  { %v3708_v41 = vpop.f32.mrb[5].mxu0 }
 0x3f7   :  { %v4330_v43 = vadd.f32 %v3671_v39, %v1818_v27  ;;  %v3709_v44 = vadd.f32 %v3708_v41, %v3707_v25 }
 0x3f9   :  { %v4331_v55 = vadd.f32 %v4330_v43, %v3709_v44 }
 0x415   :  { %v3783_v45 = vpop.f32.mrb[6].mxu0 }
 0x416   :  { %v3784_v48 = vpop.f32.mrb[7].mxu0 }
 0x417   :  { %v3785_v49 = vadd.f32 %v3784_v48, %v3783_v45 }
 0x41f   :  { %v3745_v1 = vpop.f32.mrb[6].mxu1 }
 0x420   :  { %v3746_v50 = vpop.f32.mrb[7].mxu1 }
 0x421   :  { %v3747_v0 = vadd.f32 %v3746_v50, %v3745_v1 }
 0x423   :  { %v4332_v51 = vadd.f32 %v4331_v55, %v3747_v0 }
 0x425   :  { %v4333_v52 = vadd.f32 %v4332_v51, %v3785_v49 }
 0x471   :  { %v3821_v6 = vpop.f32.mrb[8].mxu1 }
 0x472   :  { %v3822_v7 = vpop.f32.mrb[9].mxu1 }
 0x473   :  { %v3823_v10 = vadd.f32 %v3822_v7, %v3821_v6  ;;  %v3859_v53 = vpop.f32.mrb[8].mxu0 }
 0x474   :  { %v3860_v54 = vpop.f32.mrb[9].mxu0 }
 0x475   :  { %v4334_v56 = vadd.f32 %v4333_v52, %v3823_v10  ;;  %v3861_v57 = vadd.f32 %v3860_v54, %v3859_v53 }
 0x477   :  { %v4335_v58 = vadd.f32 %v4334_v56, %v3861_v57 }
 0x493   :  { %v3935_v59 = vpop.f32.mrb[10].mxu0 }
 0x494   :  { %v3936_v60 = vpop.f32.mrb[11].mxu0 }
 0x495   :  { %v3937_v61 = vadd.f32 %v3936_v60, %v3935_v59 }
 0x49d   :  { %v3897_v62 = vpop.f32.mrb[10].mxu1 }
 0x49e   :  { %v3898_v63 = vpop.f32.mrb[11].mxu1 }
 0x49f   :  { %v3899_v2 = vadd.f32 %v3898_v63, %v3897_v62 }
 0x4a1   :  { %v4336_v3 = vadd.f32 %v4335_v58, %v3899_v2 }
 0x4a3   :  { %v4337_v4 = vadd.f32 %v4336_v3, %v3937_v61 }
 0x4a9   :  { %v3299_v5 = vpop.f32.mrb[4].mxu1 }
 0x4aa   :  { %v4338_v42 = vadd.f32 %v4337_v4, %v3299_v5  ;;  %v4041_v8 = vpop.f32.mrb[5].mxu1 }
 0x4ac   :  { %3305 = vst.msk [vmem:[#allocation3] sm:$0x3] %vm3304_vm1, %v4338_v42 }
 0x4ad   :  { %4463 = shalt.err (!%p4460_p4)
}
 0x4ae   :  { %s4464_s1 = scalar_lea.hbm %s5674_s5, 32 }
 0x4af   :  { %p4465_p5 = scmp.ne.s32.totalorder %s5674_s5, %s4464_s1  ;;  %p4468_p6 = scmp.lt.u32.totalorder %s4464_s1, %s5674_s5 }
 0x4b1   :  { %p4470_p7 = pnand %p4468_p6, %p4465_p5 }
 0x4b3   :  { %4473 = shalt.err (!%p4470_p7)
}
 0x4b4   :  { %3315 = dma.vmem_to_hbm [thread:$0]  %s3313_s30, 32, %s5674_s5, [#allocation4]  }
 0x4b5   :  { %4474 = dma.done.wait [#allocation4], 32  }
 0x4b6   :  { %4475 = vsyncadd [#allocation4], 4294967264 }
 0x4b7   :  { %3319 = vsyncpa [#allocation4], 1 }

</bundles_post_ra>
